<compile_context>
chip_gen: v7x
topology: tpu7x:2x2x1
jax: 0.10.0
libtpu: 0.0.40
codegen_flags: <defaults>
</compile_context>

<pallas_src>
import functools
import numpy as np
import jax
import jax.numpy as jnp
from jax import lax
from jax.experimental import pallas as pl
from jax.experimental.pallas import tpu as pltpu

# ------------------------- fixed "args" config -------------------------
N_AGENTS = 8
N_ACTIONS = 16
UNIT_DIM = 16
STATE_DIM = UNIT_DIM * N_AGENTS        # 128
ACTION_DIM = N_AGENTS * N_ACTIONS      # 128
EMBED_DIM = 128                        # mixing_embed_dim
N_HEAD = 4
NUM_KERNEL = 4
ATTEND_REG_COEF = 0.001
IS_MINUS_ONE = True

TB_TARGET = 512                        # batch-tile (rows per grid step)
TB_SPLIT_MIN = 128                     # BT >= 2*this -> force >= 2 grid tiles

HAU = N_HEAD * N_AGENTS * UNIT_DIM     # 512
HA = N_HEAD * N_AGENTS                 # 32
KA = NUM_KERNEL * N_AGENTS             # 32
E2 = 2 * EMBED_DIM                     # 256

# static lane offsets inside the fat `states @ W_fat` result
OFF_W1 = HAU                           # 512
OFF_KK = OFF_W1 + E2                   # 768
OFF_KA = OFF_KK + KA                   # 800
OFF_KC = OFF_KA + KA                   # 832


def _round_up(x, m):
  return ((x + m - 1) // m) * m


WFAT_ADV = _round_up(OFF_KC + KA, 128)  # 896
WFAT_V = _round_up(OFF_W1 + E2, 128)    # 768


# ------------------------------ kernel ---------------------------------
def _mixer_kernel(*refs, is_v, bt_valid, tb, padded):
  f32 = jnp.float32
  A, H, U = N_AGENTS, N_HEAD, UNIT_DIM

  if is_v:
    (q_ref, st_ref,
     fat_ref, b1_ref, w2_ref, b2_ref, segbd_ref, gsum_ref, gfold_ref, hfold_ref,
     out_ref) = refs
  else:
    (q_ref, st_ref, ac_ref,
     fat_ref, b1_ref, w2_ref, b2_ref, segbd_ref, gsum_ref, gfold_ref, hfold_ref,
     kcaw_ref, kkb_ref, kab_ref, kcb_ref,
     out_ref) = refs

  states = st_ref[...]                                    # (TB, S) compute dtype

  # valid-row mask for zero-padded batch rows (only built when padding exists)
  if padded:
    row_ids = (pl.program_id(0) * tb
               + lax.broadcasted_iota(jnp.int32, (tb, 1), 0))
    valid = (row_ids < bt_valid).astype(f32)              # (TB, 1)
  else:
    valid = 1.0

  # ---- ONE fat MXU push for every matmul whose LHS is `states` ----
  fat = jnp.dot(states, fat_ref[...], preferred_element_type=f32)   # (TB, WFAT)

  # ---------- Qatten attention logits (all heads fused) ----------
  t_all = fat[:, :HAU]                                               # (TB, 512)
  unit = states[:, :A * U].astype(f32)                               # (TB, 128)
  # TODO(synk): lane-replicating `unit` 4x is VPU/copy work hidden under MXU
  # slack (per review: only restructure if vst/VALU slots become binding).
  unit_t = jnp.concatenate([unit] * H, axis=1)                       # (TB, 512)
  logits = jnp.dot(unit_t * t_all, segbd_ref[...],
                   preferred_element_type=f32)                       # (TB, 32)

  scaled = logits * (1.0 / float(np.sqrt(EMBED_DIM)))
  # robust per-head segment max (denominator >= 1 afterwards)
  seg_cols = []
  for h in range(H):
    mh = jnp.max(scaled[:, h * A:(h + 1) * A], axis=1, keepdims=True)
    seg_cols.append(jnp.broadcast_to(mh, (scaled.shape[0], A)))
  seg_max = jnp.concatenate(seg_cols, axis=1)                        # (TB, 32)
  ex = jnp.exp(scaled - seg_max)
  denom = jnp.dot(ex, gsum_ref[...], preferred_element_type=f32)     # (TB, 32)
  r = pl.reciprocal(denom, approx=True)
  r = r * (2.0 - denom * r)                                          # Newton refine
  probs = ex * r

  # ---------- V(s) and |w_head| (shared first layer, one second-layer matmul)
  h1 = jnp.maximum(fat[:, OFF_W1:OFF_W1 + E2] + b1_ref[...], 0.0)    # (TB, 256)
  h2 = jnp.dot(h1, w2_ref[...], preferred_element_type=f32) + b2_ref[...]  # (TB, 40)
  vpa = h2[:, :A]                                  # V(s)/n_agents, per agent lane
  wh_exp = jnp.abs(h2[:, A:A + HA])                # |w_head| duplicated per agent

  w_final = jnp.dot(probs * wh_exp, gfold_ref[...],
                    preferred_element_type=f32) + 1e-10              # (TB, 8)

  # ---------- attention regularizers (per-tile partial sums) ----------
  mag = jnp.sum(jnp.sum(logits * logits * valid, axis=0, keepdims=True),
                axis=1, keepdims=True)                               # (1, 1)
  plogp = probs * jnp.log(probs + 1e-8) * valid
  ent_row = jnp.dot(jnp.sum(plogp, axis=0, keepdims=True), hfold_ref[...],
                    preferred_element_type=f32)                      # (1, H)

  # ---------- DMAQ mixing ----------
  if is_v:
    qs = q_ref[...]                                                  # (TB, 8)
    z = w_final * qs + vpa
  else:
    qmq = q_ref[...]                                                 # (TB, 16)
    qs = qmq[:, :A]
    mq = qmq[:, A:2 * A]
    adv_q = w_final * (qs - mq)              # the V(s)/n_agents terms cancel

    # DMAQ_SI_Weight (adv_hypernet_layers=1), lane-dense over (kernel, agent)
    key_lin = fat[:, OFF_KK:OFF_KK + KA] + kkb_ref[...]
    ag_lin = fat[:, OFF_KA:OFF_KA + KA] + kab_ref[...]
    acs_lin = (fat[:, OFF_KC:OFF_KC + KA]
               + jnp.dot(ac_ref[...], kcaw_ref[...], preferred_element_type=f32)
               + kcb_ref[...])
    prod = ((jnp.abs(key_lin) + 1e-10)
            * jax.nn.sigmoid(ag_lin) * jax.nn.sigmoid(acs_lin))      # (TB, 32)
    adv_w = jnp.dot(prod, gfold_ref[...], preferred_element_type=f32)  # (TB, 8)
    z = adv_q * (adv_w - 1.0) if IS_MINUS_ONE else adv_q * adv_w

  # ---------- packed lane-dense output: [ y(TB) | mag | ent(H) | 0-pad ] ----
  ones_row = jnp.ones((1, A), f32)
  y_row = lax.dot_general(ones_row, z, (((1,), (1,)), ((), ())),
                          preferred_element_type=f32)                # (1, TB)
  tail = jnp.concatenate(
      [mag, ent_row, jnp.zeros((1, 128 - 1 - H), f32)], axis=1)      # (1, 128)
  out_ref[0] = jnp.concatenate([y_row, tail], axis=1)                # (1, TB+128)


# ------------------------- constant / weight prep -----------------------
def _build_mixer_consts(params, compute_dtype, is_v):
  A, H, U, K, E, S = (N_AGENTS, N_HEAD, UNIT_DIM, NUM_KERNEL, EMBED_DIM, STATE_DIM)
  f32 = jnp.float32

  # fused selector@key extractor, tiled over agents, concatenated over heads
  comb = jnp.einsum("hse,heu->hsu", params["w_sel"], params["w_key"])   # (H, S, U)
  comb = jnp.tile(comb, (1, 1, A))                                      # (H, S, A*U)
  mcat = jnp.transpose(comb, (1, 0, 2)).reshape(S, H * A * U)           # (S, 512)

  # constant one-hot glue matrices
  segbd = np.zeros((H * A * U, H * A), np.float32)   # per-(head,agent) feature sum
  gsum = np.zeros((H * A, H * A), np.float32)        # per-head segment-sum broadcast
  gfold = np.zeros((H * A, A), np.float32)           # sum over groups -> per agent
  hfold = np.zeros((H * A, H), np.float32)           # sum over agents -> per head
  for h in range(H):
    for a in range(A):
      segbd[h * A * U + a * U:h * A * U + (a + 1) * U, h * A + a] = 1.0
      gfold[h * A + a, a] = 1.0
      hfold[h * A + a, h] = 1.0
    gsum[h * A:(h + 1) * A, h * A:(h + 1) * A] = 1.0

  # fused first layer of V(s) and hyper_w_head (shared ReLU slab)
  w1 = jnp.concatenate([params["v_w1"], params["wh_w1"]], axis=1)       # (S, 2E)
  b1 = jnp.concatenate([params["v_b1"], params["wh_b1"]], axis=1)       # (1, 2E)

  # fused second layer: lanes [0:A) -> V(s)/A per agent lane,
  #                     lanes [A:A+HA) -> w_head duplicated per agent lane
  vpa_w = jnp.tile(
      jnp.concatenate([params["v_w2"], jnp.zeros((E, 1), f32)], axis=0) / A, (1, A))
  vpa_b = jnp.tile(params["v_b2"] / A, (1, A))
  wh_w = jnp.repeat(
      jnp.concatenate([jnp.zeros((E, H), f32), params["wh_w2"]], axis=0), A, axis=1)
  wh_b = jnp.repeat(params["wh_b2"], A, axis=1)
  w2cat = jnp.concatenate([vpa_w, wh_w], axis=1)                        # (2E, 40)
  b2cat = jnp.concatenate([vpa_b, wh_b], axis=1)                        # (1, 40)

  cd = compute_dtype
  fat_cols = [mcat, w1]
  if not is_v:
    kk_exp = jnp.repeat(params["kk_w"], A, axis=1)                      # (S, 32)
    pad_w = WFAT_ADV - (OFF_KC + KA)
    fat_cols += [kk_exp, params["ka_w"], params["kcs_w"],
                 jnp.zeros((S, pad_w), f32)]
  fat = jnp.concatenate(fat_cols, axis=1).astype(cd)                    # (S, WFAT)

  shared = [fat, b1, w2cat, b2cat, jnp.asarray(segbd), jnp.asarray(gsum),
            jnp.asarray(gfold), jnp.asarray(hfold)]
  if is_v:
    return shared
  adv = [params["kca_w"].astype(cd),
         jnp.repeat(params["kk_b"], A, axis=1), params["ka_b"], params["kc_b"]]
  return shared + adv


# ------------------------------ wrapper ---------------------------------
def dmaq_qatten_mixer_forward(agent_qs, states, actions, max_q_i, params,
                              is_v=False, compute_dtype=jnp.bfloat16):
  bs, T, A = agent_qs.shape
  assert A == N_AGENTS
  BT = bs * T

  # Tile selection: big tiles amortize per-step overhead; force >=2 tiles for
  # mid-size batches so the "parallel" grid axis feeds both v7x TensorCores.
  if BT >= 2 * TB_TARGET:
    TB = TB_TARGET
  elif BT >= 2 * TB_SPLIT_MIN:
    TB = _round_up(-(-BT // 2), 8)
  else:
    TB = _round_up(BT, 8)
  num_tiles = -(-BT // TB)
  BT_pad = num_tiles * TB
  padded = BT_pad != BT

  def prep(x2d, dtype):
    x2d = x2d.astype(dtype)
    if padded:
      x2d = jnp.pad(x2d, ((0, BT_pad - BT), (0, 0)))
    return x2d

  st2 = prep(states.reshape(BT, STATE_DIM), compute_dtype)
  if is_v:
    data = [prep(agent_qs.reshape(BT, A), jnp.float32), st2]
  else:
    qmq = jnp.concatenate(
        [agent_qs.reshape(BT, A), max_q_i.reshape(BT, A)], axis=1)      # (BT, 16)
    data = [prep(qmq, jnp.float32), st2,
            prep(actions.reshape(BT, ACTION_DIM), compute_dtype)]

  weights = _build_mixer_consts(params, compute_dtype, is_v)

  def data_spec(x):
    d = x.shape[1]
    return pl.BlockSpec((TB, d), lambda i: (i, 0))

  def full_spec(x):
    nd = x.ndim
    return pl.BlockSpec(x.shape, lambda i, _n=nd: (0,) * _n)

  in_specs = [data_spec(x) for x in data] + [full_spec(w) for w in weights]

  W_OUT = TB + 128
  out_shape = jax.ShapeDtypeStruct((num_tiles, 1, W_OUT), jnp.float32)
  out_specs = pl.BlockSpec((1, 1, W_OUT), lambda i: (i, 0, 0))

  kernel = functools.partial(_mixer_kernel, is_v=is_v, bt_valid=BT,
                             tb=TB, padded=padded)

  slab = pl.pallas_call(
      kernel,
      out_shape=out_shape,
      grid=(num_tiles,),
      in_specs=in_specs,
      out_specs=out_specs,
      compiler_params=pltpu.CompilerParams(
          dimension_semantics=("parallel",),
          vmem_limit_bytes=32 * 1024 * 1024),
  )(*data, *weights)

  v_tot = slab[:, 0, :TB].reshape(BT_pad)[:BT].reshape(bs, T, 1)
  mag_part = slab[:, 0, TB]                                    # (num_tiles,)
  ent_part = slab[:, 0, TB + 1:TB + 1 + N_HEAD]                # (num_tiles, H)
  attend_mag_regs = ATTEND_REG_COEF * jnp.sum(mag_part) / (BT * N_AGENTS)
  head_entropies = -jnp.sum(ent_part, axis=0) / BT
  return v_tot, attend_mag_regs, head_entropies


# ----------------------- pure-JAX reference -----------------------------
def reference_forward(agent_qs, states, actions, max_q_i, p, is_v=False):
  bs, T, A = agent_qs.shape
  BT = bs * T
  qs = agent_qs.reshape(BT, A)
  st = states.reshape(BT, STATE_DIM)
  ac = actions.reshape(BT, ACTION_DIM)
  mq = max_q_i.reshape(BT, A)

  wh_h = jax.nn.relu(st @ p["wh_w1"] + p["wh_b1"])
  w_head = jnp.abs(wh_h @ p["wh_w2"] + p["wh_b2"])
  v_h = jax.nn.relu(st @ p["v_w1"] + p["v_b1"])
  v = v_h @ p["v_w2"] + p["v_b2"]

  unit = st[:, :A * UNIT_DIM].reshape(BT, A, UNIT_DIM)
  w_final = jnp.zeros((BT, A), jnp.float32)
  mag = 0.0
  ents = []
  for h in range(N_HEAD):
    sel = st @ p["w_sel"][h]
    t = sel @ p["w_key"][h]
    logits = jnp.einsum("bau,bu->ba", unit, t)
    probs = jax.nn.softmax(logits / np.sqrt(EMBED_DIM), axis=-1)
    w_final = w_final + probs * w_head[:, h:h + 1]
    mag = mag + jnp.mean(logits ** 2)
    ents.append(-jnp.mean(jnp.sum(probs * jnp.log(probs + 1e-8), axis=1)))
  mag = ATTEND_REG_COEF * mag
  ents = jnp.stack(ents)

  w_final = w_final + 1e-10
  vpa = v / A
  q_mix = w_final * qs + vpa
  if is_v:
    y = jnp.sum(q_mix, axis=1)
  else:
    mq_mix = w_final * mq + vpa
    adv_q = q_mix - mq_mix
    key_lin = st @ p["kk_w"] + p["kk_b"]
    ag_lin = st @ p["ka_w"] + p["ka_b"]
    ac_lin = st @ p["kcs_w"] + ac @ p["kca_w"] + p["kc_b"]
    adv_w = jnp.zeros((BT, A), jnp.float32)
    for k in range(NUM_KERNEL):
      adv_w = adv_w + (jnp.abs(key_lin[:, k:k + 1]) + 1e-10) \
          * jax.nn.sigmoid(ag_lin[:, k * A:(k + 1) * A]) \
          * jax.nn.sigmoid(ac_lin[:, k * A:(k + 1) * A])
    y = (jnp.sum(adv_q * (adv_w - 1.0), axis=1) if IS_MINUS_ONE
         else jnp.sum(adv_q * adv_w, axis=1))
  return y.reshape(bs, T, 1), mag, ents


# ------------------------- parameter init -------------------------------
def _linear_init(key, fan_in, shape):
  bound = 1.0 / np.sqrt(fan_in)
  return jax.random.uniform(key, shape, jnp.float32, -bound, bound)


def init_params(key):
  S, E, H, U, A, K, AD = (STATE_DIM, EMBED_DIM, N_HEAD, UNIT_DIM,
                          N_AGENTS, NUM_KERNEL, ACTION_DIM)
  ks = jax.random.split(key, 17)
  p = {}
  p["w_sel"] = _linear_init(ks[0], S, (H, S, E))     # selector (query) extractors
  p["w_key"] = _linear_init(ks[1], U, (H, E, U))     # key extractors
  p["v_w1"] = _linear_init(ks[2], S, (S, E))
  p["v_b1"] = _linear_init(ks[3], S, (1, E))
  p["v_w2"] = _linear_init(ks[4], E, (E, 1))
  p["v_b2"] = _linear_init(ks[5], E, (1, 1))
  p["wh_w1"] = _linear_init(ks[6], S, (S, E))
  p["wh_b1"] = _linear_init(ks[7], S, (1, E))
  p["wh_w2"] = _linear_init(ks[8], E, (E, H))
  p["wh_b2"] = _linear_init(ks[9], E, (1, H))
  p["kk_w"] = _linear_init(ks[10], S, (S, K))
  p["kk_b"] = _linear_init(ks[11], S, (1, K))
  p["ka_w"] = _linear_init(ks[12], S, (S, K * A))
  p["ka_b"] = _linear_init(ks[13], S, (1, K * A))
  sad = S + AD
  p["kcs_w"] = _linear_init(ks[14], sad, (S, K * A))
  p["kca_w"] = _linear_init(ks[15], sad, (AD, K * A))
  p["kc_b"] = _linear_init(ks[16], sad, (1, K * A))
  return p


def _check(got, ref, rtol, atol):
  np.testing.assert_allclose(np.asarray(got[0]), np.asarray(ref[0]), rtol=rtol, atol=atol)
  np.testing.assert_allclose(np.asarray(got[1]), np.asarray(ref[1]), rtol=rtol, atol=atol)
  np.testing.assert_allclose(np.asarray(got[2]), np.asarray(ref[2]), rtol=rtol, atol=atol)


# --------------------------------- main ----------------------------------
if __name__ == "__main__":
  key = jax.random.PRNGKey(0)

  def make_inputs(k, bs, T):
    k0, k1, k2, k3, k4 = jax.random.split(k, 5)
    agent_qs = jax.random.normal(k0, (bs, T, N_AGENTS), jnp.float32)
    states = jax.random.normal(k1, (bs, T, STATE_DIM), jnp.float32)
    act_idx = jax.random.randint(k2, (bs, T, N_AGENTS), 0, N_ACTIONS)
    actions = jax.nn.one_hot(act_idx, N_ACTIONS, dtype=jnp.float32)
    max_q_i = agent_qs + jnp.abs(jax.random.normal(k3, (bs, T, N_AGENTS), jnp.float32))
    params = init_params(k4)
    return agent_qs, states, actions, max_q_i, params

  # case 1: bs=2, T=8 (single tile, no padding) — f32 (tight) and bf16 (loose)
  qs, st, ac, mq, params = make_inputs(key, 2, 8)
  for is_v in (False, True):
    ref = reference_forward(qs, st, ac, mq, params, is_v=is_v)
    got32 = jax.block_until_ready(
        dmaq_qatten_mixer_forward(qs, st, ac, mq, params, is_v=is_v,
                                  compute_dtype=jnp.float32))
    _check(got32, ref, rtol=2e-3, atol=2e-3)
    got16 = jax.block_until_ready(
        dmaq_qatten_mixer_forward(qs, st, ac, mq, params, is_v=is_v,
                                  compute_dtype=jnp.bfloat16))
    _check(got16, ref, rtol=8e-2, atol=8e-2)

  # case 2: bs=3, T=11 (BT=33 -> padded tile, valid-row masking exercised)
  qs, st, ac, mq, params = make_inputs(jax.random.PRNGKey(1), 3, 11)
  ref = reference_forward(qs, st, ac, mq, params, is_v=False)
  got = jax.block_until_ready(
      dmaq_qatten_mixer_forward(qs, st, ac, mq, params, is_v=False,
                                compute_dtype=jnp.float32))
  _check(got, ref, rtol=2e-3, atol=2e-3)

  print("KERNEL_OK")
</pallas_src>

<mosaic_0001>
module attributes {stable_mosaic.version = 11 : i64} {
  func.func @_mixer_kernel(%arg0: i32, %arg1: memref<16x16xf32, #tpu.memory_space<vmem>>, %arg2: memref<16x128xf32, #tpu.memory_space<vmem>>, %arg3: memref<16x128xf32, #tpu.memory_space<vmem>>, %arg4: memref<128x896xf32, #tpu.memory_space<vmem>>, %arg5: memref<1x256xf32, #tpu.memory_space<vmem>>, %arg6: memref<256x40xf32, #tpu.memory_space<vmem>>, %arg7: memref<1x40xf32, #tpu.memory_space<vmem>>, %arg8: memref<512x32xf32, #tpu.memory_space<vmem>>, %arg9: memref<32x32xf32, #tpu.memory_space<vmem>>, %arg10: memref<32x8xf32, #tpu.memory_space<vmem>>, %arg11: memref<32x4xf32, #tpu.memory_space<vmem>>, %arg12: memref<128x32xf32, #tpu.memory_space<vmem>>, %arg13: memref<1x32xf32, #tpu.memory_space<vmem>>, %arg14: memref<1x32xf32, #tpu.memory_space<vmem>>, %arg15: memref<1x32xf32, #tpu.memory_space<vmem>>, %arg16: memref<1x1x144xf32, #tpu.memory_space<vmem>>) attributes {dimension_semantics = [#tpu.dimension_semantics<parallel>], iteration_bounds = array<i64: 1>, scalar_prefetch = 0 : i64, scratch_operands = 0 : i64, tpu.core_type = #tpu.core_type<tc>, window_params = [{transform_indices = @transform_0, window_bounds = array<i64: 16, 16>}, {transform_indices = @transform_1, window_bounds = array<i64: 16, 128>}, {transform_indices = @transform_2, window_bounds = array<i64: 16, 128>}, {pipeline_mode = #tpu.pipeline_mode<synchronous>, transform_indices = @transform_3, window_bounds = array<i64: 128, 896>}, {pipeline_mode = #tpu.pipeline_mode<synchronous>, transform_indices = @transform_4, window_bounds = array<i64: 1, 256>}, {pipeline_mode = #tpu.pipeline_mode<synchronous>, transform_indices = @transform_5, window_bounds = array<i64: 256, 40>}, {pipeline_mode = #tpu.pipeline_mode<synchronous>, transform_indices = @transform_6, window_bounds = array<i64: 1, 40>}, {pipeline_mode = #tpu.pipeline_mode<synchronous>, transform_indices = @transform_7, window_bounds = array<i64: 512, 32>}, {pipeline_mode = #tpu.pipeline_mode<synchronous>, transform_indices = @transform_8, window_bounds = array<i64: 32, 32>}, {pipeline_mode = #tpu.pipeline_mode<synchronous>, transform_indices = @transform_9, window_bounds = array<i64: 32, 8>}, {pipeline_mode = #tpu.pipeline_mode<synchronous>, transform_indices = @transform_10, window_bounds = array<i64: 32, 4>}, {pipeline_mode = #tpu.pipeline_mode<synchronous>, transform_indices = @transform_11, window_bounds = array<i64: 128, 32>}, {pipeline_mode = #tpu.pipeline_mode<synchronous>, transform_indices = @transform_12, window_bounds = array<i64: 1, 32>}, {pipeline_mode = #tpu.pipeline_mode<synchronous>, transform_indices = @transform_13, window_bounds = array<i64: 1, 32>}, {pipeline_mode = #tpu.pipeline_mode<synchronous>, transform_indices = @transform_14, window_bounds = array<i64: 1, 32>}, {transform_indices = @transform_15, window_bounds = array<i64: 1, 1, 144>}]} {
    %c0 = arith.constant 0 : index
    %c0_0 = arith.constant 0 : index
    %0 = vector.load %arg2[%c0, %c0_0] : memref<16x128xf32, #tpu.memory_space<vmem>>, vector<16x128xf32>
    %c0_1 = arith.constant 0 : index
    %c0_2 = arith.constant 0 : index
    %1 = vector.load %arg4[%c0_1, %c0_2] : memref<128x896xf32, #tpu.memory_space<vmem>>, vector<128x896xf32>
    %cst = arith.constant dense<0.000000e+00> : vector<16x896xf32>
    %2 = tpu.matmul %0, %1, %cst {dimension_numbers = #tpu.dot_dimension_numbers<[1], [0], [0], [1], [0, 0, 1, 1], [], []>} : vector<16x128xf32>, vector<128x896xf32>, vector<16x896xf32> -> vector<16x896xf32>
    %3 = vector.extract_strided_slice %2 {offsets = [0, 0], sizes = [16, 512], strides = [1, 1]} : vector<16x896xf32> to vector<16x512xf32>
    %4 = tpu.concatenate %0, %0, %0, %0 in 1 : vector<16x128xf32>, vector<16x128xf32>, vector<16x128xf32>, vector<16x128xf32> -> vector<16x512xf32>
    %5 = arith.mulf %4, %3 : vector<16x512xf32>
    %c0_3 = arith.constant 0 : index
    %c0_4 = arith.constant 0 : index
    %6 = vector.load %arg8[%c0_3, %c0_4] : memref<512x32xf32, #tpu.memory_space<vmem>>, vector<512x32xf32>
    %cst_5 = arith.constant dense<0.000000e+00> : vector<16x32xf32>
    %7 = tpu.matmul %5, %6, %cst_5 {dimension_numbers = #tpu.dot_dimension_numbers<[1], [0], [0], [1], [0, 0, 1, 1], [], []>} : vector<16x512xf32>, vector<512x32xf32>, vector<16x32xf32> -> vector<16x32xf32>
    %cst_6 = arith.constant 0.0883883461 : f32
    %8 = vector.broadcast %cst_6 : f32 to vector<16x32xf32>
    %9 = arith.mulf %7, %8 : vector<16x32xf32>
    %10 = vector.extract_strided_slice %9 {offsets = [0, 0], sizes = [16, 8], strides = [1, 1]} : vector<16x32xf32> to vector<16x8xf32>
    %cst_7 = arith.constant dense<0xFF800000> : vector<16xf32>
    %11 = vector.multi_reduction <maximumf>, %10, %cst_7 [1] : vector<16x8xf32> to vector<16xf32>
    %12 = vector.shape_cast %11 : vector<16xf32> to vector<16x1xf32>
    %13 = vector.shape_cast %12 : vector<16x1xf32> to vector<16x1xf32>
    %14 = vector.broadcast %13 : vector<16x1xf32> to vector<16x8xf32>
    %15 = vector.extract_strided_slice %9 {offsets = [0, 8], sizes = [16, 8], strides = [1, 1]} : vector<16x32xf32> to vector<16x8xf32>
    %cst_8 = arith.constant dense<0xFF800000> : vector<16xf32>
    %16 = vector.multi_reduction <maximumf>, %15, %cst_8 [1] : vector<16x8xf32> to vector<16xf32>
    %17 = vector.shape_cast %16 : vector<16xf32> to vector<16x1xf32>
    %18 = vector.shape_cast %17 : vector<16x1xf32> to vector<16x1xf32>
    %19 = vector.broadcast %18 : vector<16x1xf32> to vector<16x8xf32>
    %20 = vector.extract_strided_slice %9 {offsets = [0, 16], sizes = [16, 8], strides = [1, 1]} : vector<16x32xf32> to vector<16x8xf32>
    %cst_9 = arith.constant dense<0xFF800000> : vector<16xf32>
    %21 = vector.multi_reduction <maximumf>, %20, %cst_9 [1] : vector<16x8xf32> to vector<16xf32>
    %22 = vector.shape_cast %21 : vector<16xf32> to vector<16x1xf32>
    %23 = vector.shape_cast %22 : vector<16x1xf32> to vector<16x1xf32>
    %24 = vector.broadcast %23 : vector<16x1xf32> to vector<16x8xf32>
    %25 = vector.extract_strided_slice %9 {offsets = [0, 24], sizes = [16, 8], strides = [1, 1]} : vector<16x32xf32> to vector<16x8xf32>
    %cst_10 = arith.constant dense<0xFF800000> : vector<16xf32>
    %26 = vector.multi_reduction <maximumf>, %25, %cst_10 [1] : vector<16x8xf32> to vector<16xf32>
    %27 = vector.shape_cast %26 : vector<16xf32> to vector<16x1xf32>
    %28 = vector.shape_cast %27 : vector<16x1xf32> to vector<16x1xf32>
    %29 = vector.broadcast %28 : vector<16x1xf32> to vector<16x8xf32>
    %30 = tpu.concatenate %14, %19, %24, %29 in 1 : vector<16x8xf32>, vector<16x8xf32>, vector<16x8xf32>, vector<16x8xf32> -> vector<16x32xf32>
    %31 = arith.subf %9, %30 : vector<16x32xf32>
    %32 = math.exp %31 : vector<16x32xf32>
    %c0_11 = arith.constant 0 : index
    %c0_12 = arith.constant 0 : index
    %33 = vector.load %arg9[%c0_11, %c0_12] : memref<32x32xf32, #tpu.memory_space<vmem>>, vector<32x32xf32>
    %cst_13 = arith.constant dense<0.000000e+00> : vector<16x32xf32>
    %34 = tpu.matmul %32, %33, %cst_13 {dimension_numbers = #tpu.dot_dimension_numbers<[1], [0], [0], [1], [0, 0, 1, 1], [], []>} : vector<16x32xf32>, vector<32x32xf32>, vector<16x32xf32> -> vector<16x32xf32>
    %35 = tpu.reciprocal %34 {approx = true} : vector<16x32xf32> -> vector<16x32xf32>
    %36 = arith.mulf %34, %35 : vector<16x32xf32>
    %cst_14 = arith.constant 2.000000e+00 : f32
    %37 = vector.broadcast %cst_14 : f32 to vector<16x32xf32>
    %38 = arith.subf %37, %36 : vector<16x32xf32>
    %39 = arith.mulf %35, %38 : vector<16x32xf32>
    %40 = arith.mulf %32, %39 : vector<16x32xf32>
    %41 = vector.extract_strided_slice %2 {offsets = [0, 512], sizes = [16, 256], strides = [1, 1]} : vector<16x896xf32> to vector<16x256xf32>
    %c0_15 = arith.constant 0 : index
    %c0_16 = arith.constant 0 : index
    %42 = vector.load %arg5[%c0_15, %c0_16] : memref<1x256xf32, #tpu.memory_space<vmem>>, vector<1x256xf32>
    %43 = vector.broadcast %42 : vector<1x256xf32> to vector<16x256xf32>
    %44 = arith.addf %41, %43 : vector<16x256xf32>
    %cst_17 = arith.constant 0.000000e+00 : f32
    %45 = vector.broadcast %cst_17 : f32 to vector<16x256xf32>
    %46 = arith.maximumf %44, %45 : vector<16x256xf32>
    %c0_18 = arith.constant 0 : index
    %c0_19 = arith.constant 0 : index
    %47 = vector.load %arg6[%c0_18, %c0_19] : memref<256x40xf32, #tpu.memory_space<vmem>>, vector<256x40xf32>
    %cst_20 = arith.constant dense<0.000000e+00> : vector<16x40xf32>
    %48 = tpu.matmul %46, %47, %cst_20 {dimension_numbers = #tpu.dot_dimension_numbers<[1], [0], [0], [1], [0, 0, 1, 1], [], []>} : vector<16x256xf32>, vector<256x40xf32>, vector<16x40xf32> -> vector<16x40xf32>
    %c0_21 = arith.constant 0 : index
    %c0_22 = arith.constant 0 : index
    %49 = vector.load %arg7[%c0_21, %c0_22] : memref<1x40xf32, #tpu.memory_space<vmem>>, vector<1x40xf32>
    %50 = vector.broadcast %49 : vector<1x40xf32> to vector<16x40xf32>
    %51 = arith.addf %48, %50 : vector<16x40xf32>
    %52 = vector.extract_strided_slice %51 {offsets = [0, 8], sizes = [16, 32], strides = [1, 1]} : vector<16x40xf32> to vector<16x32xf32>
    %53 = math.absf %52 : vector<16x32xf32>
    %54 = arith.mulf %40, %53 : vector<16x32xf32>
    %c0_23 = arith.constant 0 : index
    %c0_24 = arith.constant 0 : index
    %55 = vector.load %arg10[%c0_23, %c0_24] : memref<32x8xf32, #tpu.memory_space<vmem>>, vector<32x8xf32>
    %cst_25 = arith.constant dense<0.000000e+00> : vector<16x8xf32>
    %56 = tpu.matmul %54, %55, %cst_25 {dimension_numbers = #tpu.dot_dimension_numbers<[1], [0], [0], [1], [0, 0, 1, 1], [], []>} : vector<16x32xf32>, vector<32x8xf32>, vector<16x8xf32> -> vector<16x8xf32>
    %cst_26 = arith.constant 1.000000e-10 : f32
    %57 = vector.broadcast %cst_26 : f32 to vector<16x8xf32>
    %58 = arith.addf %56, %57 : vector<16x8xf32>
    %59 = arith.mulf %7, %7 : vector<16x32xf32>
    %cst_27 = arith.constant 1.000000e+00 : f32
    %60 = vector.broadcast %cst_27 : f32 to vector<16x32xf32>
    %61 = arith.mulf %59, %60 : vector<16x32xf32>
    %cst_28 = arith.constant dense<0.000000e+00> : vector<32xf32>
    %62 = vector.multi_reduction <add>, %61, %cst_28 [0] : vector<16x32xf32> to vector<32xf32>
    %63 = vector.shape_cast %62 : vector<32xf32> to vector<1x32xf32>
    %cst_29 = arith.constant dense<0.000000e+00> : vector<1xf32>
    %64 = vector.multi_reduction <add>, %63, %cst_29 [1] : vector<1x32xf32> to vector<1xf32>
    %65 = vector.shape_cast %64 : vector<1xf32> to vector<1x1xf32>
    %cst_30 = arith.constant 9.99999993E-9 : f32
    %66 = vector.broadcast %cst_30 : f32 to vector<16x32xf32>
    %67 = arith.addf %40, %66 : vector<16x32xf32>
    %68 = math.log %67 : vector<16x32xf32>
    %69 = arith.mulf %40, %68 : vector<16x32xf32>
    %cst_31 = arith.constant 1.000000e+00 : f32
    %70 = vector.broadcast %cst_31 : f32 to vector<16x32xf32>
    %71 = arith.mulf %69, %70 : vector<16x32xf32>
    %cst_32 = arith.constant dense<0.000000e+00> : vector<32xf32>
    %72 = vector.multi_reduction <add>, %71, %cst_32 [0] : vector<16x32xf32> to vector<32xf32>
    %73 = vector.shape_cast %72 : vector<32xf32> to vector<1x32xf32>
    %c0_33 = arith.constant 0 : index
    %c0_34 = arith.constant 0 : index
    %74 = vector.load %arg11[%c0_33, %c0_34] : memref<32x4xf32, #tpu.memory_space<vmem>>, vector<32x4xf32>
    %cst_35 = arith.constant dense<0.000000e+00> : vector<1x4xf32>
    %75 = tpu.matmul %73, %74, %cst_35 {dimension_numbers = #tpu.dot_dimension_numbers<[1], [0], [0], [1], [0, 0, 1, 1], [], []>} : vector<1x32xf32>, vector<32x4xf32>, vector<1x4xf32> -> vector<1x4xf32>
    %c0_36 = arith.constant 0 : index
    %c0_37 = arith.constant 0 : index
    %76 = vector.load %arg1[%c0_36, %c0_37] : memref<16x16xf32, #tpu.memory_space<vmem>>, vector<16x16xf32>
    %77 = vector.extract_strided_slice %76 {offsets = [0, 0], sizes = [16, 8], strides = [1, 1]} : vector<16x16xf32> to vector<16x8xf32>
    %78 = vector.extract_strided_slice %76 {offsets = [0, 8], sizes = [16, 8], strides = [1, 1]} : vector<16x16xf32> to vector<16x8xf32>
    %79 = arith.subf %77, %78 : vector<16x8xf32>
    %80 = arith.mulf %58, %79 : vector<16x8xf32>
    %81 = vector.extract_strided_slice %2 {offsets = [0, 768], sizes = [16, 32], strides = [1, 1]} : vector<16x896xf32> to vector<16x32xf32>
    %c0_38 = arith.constant 0 : index
    %c0_39 = arith.constant 0 : index
    %82 = vector.load %arg13[%c0_38, %c0_39] : memref<1x32xf32, #tpu.memory_space<vmem>>, vector<1x32xf32>
    %83 = vector.broadcast %82 : vector<1x32xf32> to vector<16x32xf32>
    %84 = arith.addf %81, %83 : vector<16x32xf32>
    %85 = vector.extract_strided_slice %2 {offsets = [0, 800], sizes = [16, 32], strides = [1, 1]} : vector<16x896xf32> to vector<16x32xf32>
    %c0_40 = arith.constant 0 : index
    %c0_41 = arith.constant 0 : index
    %86 = vector.load %arg14[%c0_40, %c0_41] : memref<1x32xf32, #tpu.memory_space<vmem>>, vector<1x32xf32>
    %87 = vector.broadcast %86 : vector<1x32xf32> to vector<16x32xf32>
    %88 = arith.addf %85, %87 : vector<16x32xf32>
    %89 = vector.extract_strided_slice %2 {offsets = [0, 832], sizes = [16, 32], strides = [1, 1]} : vector<16x896xf32> to vector<16x32xf32>
    %c0_42 = arith.constant 0 : index
    %c0_43 = arith.constant 0 : index
    %90 = vector.load %arg3[%c0_42, %c0_43] : memref<16x128xf32, #tpu.memory_space<vmem>>, vector<16x128xf32>
    %c0_44 = arith.constant 0 : index
    %c0_45 = arith.constant 0 : index
    %91 = vector.load %arg12[%c0_44, %c0_45] : memref<128x32xf32, #tpu.memory_space<vmem>>, vector<128x32xf32>
    %cst_46 = arith.constant dense<0.000000e+00> : vector<16x32xf32>
    %92 = tpu.matmul %90, %91, %cst_46 {dimension_numbers = #tpu.dot_dimension_numbers<[1], [0], [0], [1], [0, 0, 1, 1], [], []>} : vector<16x128xf32>, vector<128x32xf32>, vector<16x32xf32> -> vector<16x32xf32>
    %93 = arith.addf %89, %92 : vector<16x32xf32>
    %c0_47 = arith.constant 0 : index
    %c0_48 = arith.constant 0 : index
    %94 = vector.load %arg15[%c0_47, %c0_48] : memref<1x32xf32, #tpu.memory_space<vmem>>, vector<1x32xf32>
    %95 = vector.broadcast %94 : vector<1x32xf32> to vector<16x32xf32>
    %96 = arith.addf %93, %95 : vector<16x32xf32>
    %97 = math.absf %84 : vector<16x32xf32>
    %cst_49 = arith.constant 1.000000e-10 : f32
    %98 = vector.broadcast %cst_49 : f32 to vector<16x32xf32>
    %99 = arith.addf %97, %98 : vector<16x32xf32>
    %100 = arith.negf %88 : vector<16x32xf32>
    %101 = math.exp %100 : vector<16x32xf32>
    %cst_50 = arith.constant 1.000000e+00 : f32
    %102 = vector.broadcast %cst_50 : f32 to vector<16x32xf32>
    %103 = arith.addf %102, %101 : vector<16x32xf32>
    %104 = arith.divf %102, %103 : vector<16x32xf32>
    %105 = arith.mulf %99, %104 : vector<16x32xf32>
    %106 = arith.negf %96 : vector<16x32xf32>
    %107 = math.exp %106 : vector<16x32xf32>
    %cst_51 = arith.constant 1.000000e+00 : f32
    %108 = vector.broadcast %cst_51 : f32 to vector<16x32xf32>
    %109 = arith.addf %108, %107 : vector<16x32xf32>
    %110 = arith.divf %108, %109 : vector<16x32xf32>
    %111 = arith.mulf %105, %110 : vector<16x32xf32>
    %c0_52 = arith.constant 0 : index
    %c0_53 = arith.constant 0 : index
    %112 = vector.load %arg10[%c0_52, %c0_53] : memref<32x8xf32, #tpu.memory_space<vmem>>, vector<32x8xf32>
    %cst_54 = arith.constant dense<0.000000e+00> : vector<16x8xf32>
    %113 = tpu.matmul %111, %112, %cst_54 {dimension_numbers = #tpu.dot_dimension_numbers<[1], [0], [0], [1], [0, 0, 1, 1], [], []>} : vector<16x32xf32>, vector<32x8xf32>, vector<16x8xf32> -> vector<16x8xf32>
    %cst_55 = arith.constant 1.000000e+00 : f32
    %114 = vector.broadcast %cst_55 : f32 to vector<16x8xf32>
    %115 = arith.subf %113, %114 : vector<16x8xf32>
    %116 = arith.mulf %80, %115 : vector<16x8xf32>
    %cst_56 = arith.constant 1.000000e+00 : f32
    %117 = vector.broadcast %cst_56 : f32 to vector<1x8xf32>
    %cst_57 = arith.constant dense<0.000000e+00> : vector<1x16xf32>
    %118 = tpu.matmul %117, %116, %cst_57 {dimension_numbers = #tpu.dot_dimension_numbers<[1], [1], [0], [0], [0, 0, 1, 0], [], []>} : vector<1x8xf32>, vector<16x8xf32>, vector<1x16xf32> -> vector<1x16xf32>
    %cst_58 = arith.constant 0.000000e+00 : f32
    %119 = vector.broadcast %cst_58 : f32 to vector<1x123xf32>
    %120 = tpu.concatenate %65, %75, %119 in 1 : vector<1x1xf32>, vector<1x4xf32>, vector<1x123xf32> -> vector<1x128xf32>
    %121 = tpu.concatenate %118, %120 in 1 : vector<1x16xf32>, vector<1x128xf32> -> vector<1x144xf32>
    %c0_59 = arith.constant 0 : index
    %c0_60 = arith.constant 0 : index
    %c0_61 = arith.constant 0 : index
    %122 = vector.load %arg16[%c0_59, %c0_60, %c0_61] : memref<1x1x144xf32, #tpu.memory_space<vmem>>, vector<1x1x144xf32>
    %123 = vector.shape_cast %122 : vector<1x1x144xf32> to vector<1x144xf32>
    %124 = vector.shape_cast %121 : vector<1x144xf32> to vector<1x1x144xf32>
    tpu.vector_store %arg16[%c0_59, %c0_60, %c0_61], %124 {strides = array<i32>} : memref<1x1x144xf32, #tpu.memory_space<vmem>>, vector<1x1x144xf32>,
    return
  }
  func.func @transform_0(%arg0: i32) -> (i32, i32) {
    %c0_i32 = arith.constant 0 : i32
    %c0_i32_0 = arith.constant 0 : i32
    return %arg0, %c0_i32 : i32, i32
  }
  func.func @transform_1(%arg0: i32) -> (i32, i32) {
    %c0_i32 = arith.constant 0 : i32
    %c0_i32_0 = arith.constant 0 : i32
    return %arg0, %c0_i32 : i32, i32
  }
  func.func @transform_2(%arg0: i32) -> (i32, i32) {
    %c0_i32 = arith.constant 0 : i32
    %c0_i32_0 = arith.constant 0 : i32
    return %arg0, %c0_i32 : i32, i32
  }
  func.func @transform_3(%arg0: i32) -> (i32, i32) {
    %c0_i32 = arith.constant 0 : i32
    %c0_i32_0 = arith.constant 0 : i32
    %c0_i32_1 = arith.constant 0 : i32
    return %c0_i32, %c0_i32_0 : i32, i32
  }
  func.func @transform_4(%arg0: i32) -> (i32, i32) {
    %c0_i32 = arith.constant 0 : i32
    %c0_i32_0 = arith.constant 0 : i32
    %c0_i32_1 = arith.constant 0 : i32
    return %c0_i32, %c0_i32_0 : i32, i32
  }
  func.func @transform_5(%arg0: i32) -> (i32, i32) {
    %c0_i32 = arith.constant 0 : i32
    %c0_i32_0 = arith.constant 0 : i32
    %c0_i32_1 = arith.constant 0 : i32
    return %c0_i32, %c0_i32_0 : i32, i32
  }
  func.func @transform_6(%arg0: i32) -> (i32, i32) {
    %c0_i32 = arith.constant 0 : i32
    %c0_i32_0 = arith.constant 0 : i32
    %c0_i32_1 = arith.constant 0 : i32
    return %c0_i32, %c0_i32_0 : i32, i32
  }
  func.func @transform_7(%arg0: i32) -> (i32, i32) {
    %c0_i32 = arith.constant 0 : i32
    %c0_i32_0 = arith.constant 0 : i32
    %c0_i32_1 = arith.constant 0 : i32
    return %c0_i32, %c0_i32_0 : i32, i32
  }
  func.func @transform_8(%arg0: i32) -> (i32, i32) {
    %c0_i32 = arith.constant 0 : i32
    %c0_i32_0 = arith.constant 0 : i32
    %c0_i32_1 = arith.constant 0 : i32
    return %c0_i32, %c0_i32_0 : i32, i32
  }
  func.func @transform_9(%arg0: i32) -> (i32, i32) {
    %c0_i32 = arith.constant 0 : i32
    %c0_i32_0 = arith.constant 0 : i32
    %c0_i32_1 = arith.constant 0 : i32
    return %c0_i32, %c0_i32_0 : i32, i32
  }
  func.func @transform_10(%arg0: i32) -> (i32, i32) {
    %c0_i32 = arith.constant 0 : i32
    %c0_i32_0 = arith.constant 0 : i32
    %c0_i32_1 = arith.constant 0 : i32
    return %c0_i32, %c0_i32_0 : i32, i32
  }
  func.func @transform_11(%arg0: i32) -> (i32, i32) {
    %c0_i32 = arith.constant 0 : i32
    %c0_i32_0 = arith.constant 0 : i32
    %c0_i32_1 = arith.constant 0 : i32
    return %c0_i32, %c0_i32_0 : i32, i32
  }
  func.func @transform_12(%arg0: i32) -> (i32, i32) {
    %c0_i32 = arith.constant 0 : i32
    %c0_i32_0 = arith.constant 0 : i32
    %c0_i32_1 = arith.constant 0 : i32
    return %c0_i32, %c0_i32_0 : i32, i32
  }
  func.func @transform_13(%arg0: i32) -> (i32, i32) {
    %c0_i32 = arith.constant 0 : i32
    %c0_i32_0 = arith.constant 0 : i32
    %c0_i32_1 = arith.constant 0 : i32
    return %c0_i32, %c0_i32_0 : i32, i32
  }
  func.func @transform_14(%arg0: i32) -> (i32, i32) {
    %c0_i32 = arith.constant 0 : i32
    %c0_i32_0 = arith.constant 0 : i32
    %c0_i32_1 = arith.constant 0 : i32
    return %c0_i32, %c0_i32_0 : i32, i32
  }
  func.func @transform_15(%arg0: i32) -> (i32, i32, i32) {
    %c0_i32 = arith.constant 0 : i32
    %c0_i32_0 = arith.constant 0 : i32
    %c0_i32_1 = arith.constant 0 : i32
    return %arg0, %c0_i32, %c0_i32_0 : i32, i32, i32
  }
}

</mosaic_0001>

<bundles_post_ra>
// kernel: tpu_custom_call.1
= control target key start
LH: loop header
LB: loop body
LE: loop exit
PB: predicated region body
PF: predicated region fallthrough
CT: control target
= control target key end

     0   :  { %v2252_v7 = vmov 0.0   ;;  %s3199_s0 = inlined_call_operand.vmem [shape: f32[16,16], index: 0, kind: input, shape index: {}]   ;;  %s3200_s1 = inlined_call_operand.vmem [shape: f32[16,128], index: 1, kind: input, shape index: {}]   ;;  %s3201_s2 = inlined_call_operand.vmem [shape: f32[16,128], index: 2, kind: input, shape index: {}]   ;;  %s3202_s3 = inlined_call_operand.vmem [shape: f32[128,896], index: 3, kind: input, shape index: {}]   ;;  %s3203_s4 = inlined_call_operand.vmem [shape: f32[1,256], index: 4, kind: input, shape index: {}]   ;;  %s3204_s5 = inlined_call_operand.vmem [shape: f32[256,40], index: 5, kind: input, shape index: {}]   ;;  %s3205_s6 = inlined_call_operand.vmem [shape: f32[1,40], index: 6, kind: input, shape index: {}]   ;;  %s3206_s7 = inlined_call_operand.vmem [shape: f32[512,32], index: 7, kind: input, shape index: {}]   ;;  %s3207_s8 = inlined_call_operand.vmem [shape: f32[32,32], index: 8, kind: input, shape index: {}]   ;;  %s3208_s9 = inlined_call_operand.vmem [shape: f32[32,8], index: 9, kind: input, shape index: {}]   ;;  %s3209_s10 = inlined_call_operand.vmem [shape: f32[32,4], index: 10, kind: input, shape index: {}]   ;;  %s3210_s11 = inlined_call_operand.vmem [shape: f32[128,32], index: 11, kind: input, shape index: {}]   ;;  %s3211_s12 = inlined_call_operand.vmem [shape: f32[1,32], index: 12, kind: input, shape index: {}]   ;;  %s3212_s13 = inlined_call_operand.vmem [shape: f32[1,32], index: 13, kind: input, shape index: {}]   ;;  %s3213_s14 = inlined_call_operand.vmem [shape: f32[1,32], index: 14, kind: input, shape index: {}]   ;;  %s3214_s15 = inlined_call_operand.hbm [shape: f32[1,1,144], index: 15, kind: output, shape index: {}]  }
   0x1   :  { %v54_v0 = vld [vmem:[%s3202_s3 + $0x8] sm:$0xff]  ;;  %v61_v1 = vld [vmem:[%s3202_s3 + $0x40] sm:$0xff]  ;;  %v56_v2 = vld [vmem:[%s3202_s3 + $0x18] sm:$0xff]  ;;  %229 = vmatprep.mubr.f32.mxu0 %v2252_v7  ;;  %306 = vmatprep.mubr.f32.mxu1 %v2252_v7 }
   0x2   :  { %v1898_v3 = vpack.c.bf16 %v61_v1, %v54_v0  ;;  %v63_v4 = vld [vmem:[%s3202_s3 + $0x50] sm:$0xff]  ;;  %v53_v5 = vld [vmem:[%s3202_s3] sm:$0xff]  ;;  %v60_v6 = vld [vmem:[%s3202_s3 + $0x38] sm:$0xff] }
   0x3   :  { %v1930_v8 = vpack.c.bf16 %v63_v4, %v56_v2  ;;  %v1900_v9 = vpack.c.bf16 %v60_v6, %v53_v5  ;;  %v55_v10 = vld [vmem:[%s3202_s3 + $0x10] sm:$0xff]  ;;  %v62_v11 = vld [vmem:[%s3202_s3 + $0x48] sm:$0xff]  ;;  %v68_v12 = vld [vmem:[%s3202_s3 + $0x78] sm:$0xff] }
   0x4   :  { %1899 = vmatprep.subr.bf16.mxu0 %v1898_v3  ;;  %v1932_v13 = vpack.c.bf16 %v62_v11, %v55_v10  ;;  %v75_v14 = vld [vmem:[%s3202_s3 + $0xb0] sm:$0xff]  ;;  %v70_v15 = vld [vmem:[%s3202_s3 + $0x88] sm:$0xff]  ;;  %v77_v16 = vld [vmem:[%s3202_s3 + $0xc0] sm:$0xff] }
   0x5   :  { %1931 = vmatprep.subr.bf16.mxu1 %v1930_v8  ;;  %1901 = vmatpush1.bf16.msra.mxu0 %v1900_v9  ;;  %v1902_v17 = vpack.c.bf16 %v75_v14, %v68_v12  ;;  %v1934_v18 = vpack.c.bf16 %v77_v16, %v70_v15  ;;  %v67_v19 = vld [vmem:[%s3202_s3 + $0x70] sm:$0xff]  ;;  %v74_v20 = vld [vmem:[%s3202_s3 + $0xa8] sm:$0xff]  ;;  %v69_v21 = vld [vmem:[%s3202_s3 + $0x80] sm:$0xff] }
   0x6   :  { %1933 = vmatpush1.bf16.msra.mxu1 %v1932_v13  ;;  %v1904_v22 = vpack.c.bf16 %v74_v20, %v67_v19  ;;  %v76_v23 = vld [vmem:[%s3202_s3 + $0xb8] sm:$0xff]  ;;  %v82_v24 = vld [vmem:[%s3202_s3 + $0xe8] sm:$0xff]  ;;  %v89_v25 = vld [vmem:[%s3202_s3 + $0x120] sm:$0xff] }
   0x7   :  { %1903 = vmatprep.subr.bf16.mxu0 %v1902_v17  ;;  %1935 = vmatprep.subr.bf16.mxu1 %v1934_v18  ;;  %v1936_v26 = vpack.c.bf16 %v76_v23, %v69_v21  ;;  %v1906_v27 = vpack.c.bf16 %v89_v25, %v82_v24  ;;  %v84_v28 = vld [vmem:[%s3202_s3 + $0xf8] sm:$0xff]  ;;  %v91_v29 = vld [vmem:[%s3202_s3 + $0x130] sm:$0xff]  ;;  %v81_v30 = vld [vmem:[%s3202_s3 + $0xe0] sm:$0xff] }
   0x8   :  { %v1938_v31 = vpack.c.bf16 %v91_v29, %v84_v28  ;;  %v88_v32 = vld [vmem:[%s3202_s3 + $0x118] sm:$0xff]  ;;  %v83_v33 = vld [vmem:[%s3202_s3 + $0xf0] sm:$0xff]  ;;  %v90_v34 = vld [vmem:[%s3202_s3 + $0x128] sm:$0xff] }
   0x9   :  { %1905 = vmatpush1.bf16.msra.mxu0 %v1904_v22  ;;  %v1908_v35 = vpack.c.bf16 %v88_v32, %v81_v30  ;;  %v96_v36 = vld [vmem:[%s3202_s3 + $0x158] sm:$0xff]  ;;  %v103_v37 = vld [vmem:[%s3202_s3 + $0x190] sm:$0xff]  ;;  %v98_v38 = vld [vmem:[%s3202_s3 + $0x168] sm:$0xff]  ;;  %v1940_v39 = vpack.c.bf16 %v90_v34, %v83_v33 }
   0xa   :  { %1937 = vmatpush1.bf16.msra.mxu1 %v1936_v26  ;;  %1907 = vmatprep.subr.bf16.mxu0 %v1906_v27  ;;  %v1910_v40 = vpack.c.bf16 %v103_v37, %v96_v36  ;;  %v105_v41 = vld [vmem:[%s3202_s3 + $0x1a0] sm:$0xff]  ;;  %v95_v42 = vld [vmem:[%s3202_s3 + $0x150] sm:$0xff]  ;;  %v102_v43 = vld [vmem:[%s3202_s3 + $0x188] sm:$0xff] }
   0xb   :  { %1939 = vmatprep.subr.bf16.mxu1 %v1938_v31  ;;  %v1942_v44 = vpack.c.bf16 %v105_v41, %v98_v38  ;;  %v97_v45 = vld [vmem:[%s3202_s3 + $0x160] sm:$0xff]  ;;  %v104_v46 = vld [vmem:[%s3202_s3 + $0x198] sm:$0xff]  ;;  %v110_v47 = vld [vmem:[%s3202_s3 + $0x1c8] sm:$0xff]  ;;  %v1912_v51 = vpack.c.bf16 %v102_v43, %v95_v42 }
   0xc   :  { %v117_v48 = vld [vmem:[%s3202_s3 + $0x200] sm:$0xff]  ;;  %v112_v49 = vld [vmem:[%s3202_s3 + $0x1d8] sm:$0xff]  ;;  %v119_v50 = vld [vmem:[%s3202_s3 + $0x210] sm:$0xff]  ;;  %v1944_v52 = vpack.c.bf16 %v104_v46, %v97_v45 }
   0xd   :  { %1909 = vmatpush1.bf16.msra.mxu0 %v1908_v35  ;;  %v1914_v53 = vpack.c.bf16 %v117_v48, %v110_v47  ;;  %v109_v54 = vld [vmem:[%s3202_s3 + $0x1c0] sm:$0xff]  ;;  %v116_v55 = vld [vmem:[%s3202_s3 + $0x1f8] sm:$0xff]  ;;  %v111_v56 = vld [vmem:[%s3202_s3 + $0x1d0] sm:$0xff]  ;;  %v1946_v57 = vpack.c.bf16 %v119_v50, %v112_v49 }
   0xe   :  { %1941 = vmatpush1.bf16.msra.mxu1 %v1940_v39  ;;  %1911 = vmatprep.subr.bf16.mxu0 %v1910_v40  ;;  %v118_v58 = vld [vmem:[%s3202_s3 + $0x208] sm:$0xff]  ;;  %v124_v59 = vld [vmem:[%s3202_s3 + $0x238] sm:$0xff]  ;;  %v131_v60 = vld [vmem:[%s3202_s3 + $0x270] sm:$0xff]  ;;  %v1916_v63 = vpack.c.bf16 %v116_v55, %v109_v54 }
   0xf   :  { %1943 = vmatprep.subr.bf16.mxu1 %v1942_v44  ;;  %v126_v61 = vld [vmem:[%s3202_s3 + $0x248] sm:$0xff]  ;;  %v133_v62 = vld [vmem:[%s3202_s3 + $0x280] sm:$0xff]  ;;  %v1948_v0 = vpack.c.bf16 %v118_v58, %v111_v56  ;;  %v1918_v1 = vpack.c.bf16 %v131_v60, %v124_v59  ;;  %v123_v2 = vld [vmem:[%s3202_s3 + $0x230] sm:$0xff] }
  0x10   :  { %v130_v3 = vld [vmem:[%s3202_s3 + $0x268] sm:$0xff]  ;;  %v125_v4 = vld [vmem:[%s3202_s3 + $0x240] sm:$0xff]  ;;  %v1950_v5 = vpack.c.bf16 %v133_v62, %v126_v61  ;;  %v132_v6 = vld [vmem:[%s3202_s3 + $0x278] sm:$0xff] }
  0x11   :  { %1913 = vmatpush1.bf16.msra.mxu0 %v1912_v51  ;;  %v138_v8 = vld [vmem:[%s3202_s3 + $0x2a8] sm:$0xff]  ;;  %v145_v9 = vld [vmem:[%s3202_s3 + $0x2e0] sm:$0xff]  ;;  %v140_v10 = vld [vmem:[%s3202_s3 + $0x2b8] sm:$0xff]  ;;  %v1920_v12 = vpack.c.bf16 %v130_v3, %v123_v2  ;;  %v1952_v13 = vpack.c.bf16 %v132_v6, %v125_v4 }
  0x12   :  { %1945 = vmatpush1.bf16.msra.mxu1 %v1944_v52  ;;  %1915 = vmatprep.subr.bf16.mxu0 %v1914_v53  ;;  %v147_v11 = vld [vmem:[%s3202_s3 + $0x2f0] sm:$0xff]  ;;  %v1922_v14 = vpack.c.bf16 %v145_v9, %v138_v8  ;;  %v137_v15 = vld [vmem:[%s3202_s3 + $0x2a0] sm:$0xff]  ;;  %v144_v16 = vld [vmem:[%s3202_s3 + $0x2d8] sm:$0xff] }
  0x13   :  { %1947 = vmatprep.subr.bf16.mxu1 %v1946_v57  ;;  %v139_v17 = vld [vmem:[%s3202_s3 + $0x2b0] sm:$0xff]  ;;  %v1954_v18 = vpack.c.bf16 %v147_v11, %v140_v10  ;;  %v146_v19 = vld [vmem:[%s3202_s3 + $0x2e8] sm:$0xff]  ;;  %v152_v20 = vld [vmem:[%s3202_s3 + $0x318] sm:$0xff]  ;;  %v1924_v24 = vpack.c.bf16 %v144_v16, %v137_v15 }
  0x14   :  { %v159_v21 = vld [vmem:[%s3202_s3 + $0x350] sm:$0xff]  ;;  %v154_v22 = vld [vmem:[%s3202_s3 + $0x328] sm:$0xff]  ;;  %v161_v23 = vld [vmem:[%s3202_s3 + $0x360] sm:$0xff]  ;;  %v1956_v25 = vpack.c.bf16 %v146_v19, %v139_v17 }
  0x15   :  { %1917 = vmatpush1.bf16.msra.mxu0 %v1916_v63  ;;  %v1926_v26 = vpack.c.bf16 %v159_v21, %v152_v20  ;;  %v151_v27 = vld [vmem:[%s3202_s3 + $0x310] sm:$0xff]  ;;  %v158_v28 = vld [vmem:[%s3202_s3 + $0x348] sm:$0xff]  ;;  %v153_v29 = vld [vmem:[%s3202_s3 + $0x320] sm:$0xff]  ;;  %v1958_v30 = vpack.c.bf16 %v161_v23, %v154_v22 }
  0x16   :  { %1949 = vmatpush1.bf16.msra.mxu1 %v1948_v0  ;;  %1919 = vmatprep.subr.bf16.mxu0 %v1918_v1  ;;  %v160_v31 = vld [vmem:[%s3202_s3 + $0x358] sm:$0xff]  ;;  %v58_v32 = vld [vmem:[%s3202_s3 + $0x28] sm:$0xff]  ;;  %v65_v33 = vld [vmem:[%s3202_s3 + $0x60] sm:$0xff]  ;;  %v1928_v34 = vpack.c.bf16 %v158_v28, %v151_v27 }
  0x17   :  { %1951 = vmatprep.subr.bf16.mxu1 %v1950_v5  ;;  %v1960_v35 = vpack.c.bf16 %v160_v31, %v153_v29  ;;  %v1962_v36 = vpack.c.bf16 %v65_v33, %v58_v32  ;;  %v57_v37 = vld [vmem:[%s3202_s3 + $0x20] sm:$0xff]  ;;  %v64_v38 = vld [vmem:[%s3202_s3 + $0x58] sm:$0xff]  ;;  %v79_v40 = vld [vmem:[%s3202_s3 + $0xd0] sm:$0xff] }
  0x18   :  { %v72_v39 = vld [vmem:[%s3202_s3 + $0x98] sm:$0xff]  ;;  %v2559_v41 = vld [vmem:[%s3200_s1] sm:$0xff]  ;;  %v59_v42 = vld [vmem:[%s3202_s3 + $0x30] sm:$0xff]  ;;  %v1964_v43 = vpack.c.bf16 %v64_v38, %v57_v37 }
  0x19   :  { %1921 = vmatpush1.bf16.msra.mxu0 %v1920_v12  ;;  %v71_v44 = vld [vmem:[%s3202_s3 + $0x90] sm:$0xff]  ;;  %v66_v45 = vld [vmem:[%s3202_s3 + $0x68] sm:$0xff]  ;;  %v1966_v46 = vpack.c.bf16 %v79_v40, %v72_v39  ;;  %v73_v49 = vld [vmem:[%s3202_s3 + $0xa0] sm:$0xff] }
  0x1a   :  { %1953 = vmatpush1.bf16.msra.mxu1 %v1952_v13  ;;  %1923 = vmatprep.subr.bf16.mxu0 %v1922_v14  ;;  %v78_v47 = vld [vmem:[%s3202_s3 + $0xc8] sm:$0xff]  ;;  %v1994_v48 = vpack.c.bf16 %v66_v45, %v59_v42  ;;  %v80_v50 = vld [vmem:[%s3202_s3 + $0xd8] sm:$0xff]  ;;  %v93_v52 = vld [vmem:[%s3202_s3 + $0x140] sm:$0xff] }
  0x1b   :  { %1955 = vmatprep.subr.bf16.mxu1 %v1954_v18  ;;  %v86_v51 = vld [vmem:[%s3202_s3 + $0x108] sm:$0xff]  ;;  %v1968_v54 = vpack.c.bf16 %v78_v47, %v71_v44  ;;  %v1998_v55 = vpack.c.bf16 %v80_v50, %v73_v49  ;;  %v87_v56 = vld [vmem:[%s3202_s3 + $0x110] sm:$0xff]  ;;  %v85_v59 = vld [vmem:[%s3202_s3 + $0x100] sm:$0xff] }
  0x1c   :  { %v2591_v53 = vld [vmem:[%s3200_s1 + $0x8] sm:$0xff]  ;;  %v1970_v58 = vpack.c.bf16 %v93_v52, %v86_v51  ;;  %v92_v60 = vld [vmem:[%s3202_s3 + $0x138] sm:$0xff]  ;;  %v107_v62 = vld [vmem:[%s3202_s3 + $0x1b0] sm:$0xff] }
  0x1d   :  { %1925 = vmatpush1.bf16.msra.mxu0 %v1924_v24  ;;  %v94_v57 = vld [vmem:[%s3202_s3 + $0x148] sm:$0xff]  ;;  %v100_v61 = vld [vmem:[%s3202_s3 + $0x178] sm:$0xff]  ;;  %v1972_v0 = vpack.c.bf16 %v92_v60, %v85_v59  ;;  %v101_v1 = vld [vmem:[%s3202_s3 + $0x180] sm:$0xff] }
  0x1e   :  { %1957 = vmatpush1.bf16.msra.mxu1 %v1956_v25  ;;  %1927 = vmatprep.subr.bf16.mxu0 %v1926_v26  ;;  %v2002_v63 = vpack.c.bf16 %v94_v57, %v87_v56  ;;  %v108_v2 = vld [vmem:[%s3202_s3 + $0x1b8] sm:$0xff]  ;;  %v1974_v3 = vpack.c.bf16 %v107_v62, %v100_v61  ;;  %v99_v4 = vld [vmem:[%s3202_s3 + $0x170] sm:$0xff]  ;;  %v106_v5 = vld [vmem:[%s3202_s3 + $0x1a8] sm:$0xff] }
  0x1f   :  { %1959 = vmatprep.subr.bf16.mxu1 %v1958_v30  ;;  %v114_v6 = vld [vmem:[%s3202_s3 + $0x1e8] sm:$0xff]  ;;  %v121_v8 = vld [vmem:[%s3202_s3 + $0x220] sm:$0xff]  ;;  %v2006_v9 = vpack.c.bf16 %v108_v2, %v101_v1  ;;  %v1976_v10 = vpack.c.bf16 %v106_v5, %v99_v4  ;;  %v115_v11 = vld [vmem:[%s3202_s3 + $0x1f0] sm:$0xff] }
  0x20   :  { %v122_v12 = vld [vmem:[%s3202_s3 + $0x228] sm:$0xff]  ;;  %v1978_v13 = vpack.c.bf16 %v121_v8, %v114_v6  ;;  %v113_v14 = vld [vmem:[%s3202_s3 + $0x1e0] sm:$0xff]  ;;  %v120_v15 = vld [vmem:[%s3202_s3 + $0x218] sm:$0xff] }
  0x21   :  { %1929 = vmatpush1.bf16.msra.mxu0 %v1928_v34  ;;  %v128_v16 = vld [vmem:[%s3202_s3 + $0x258] sm:$0xff]  ;;  %v135_v17 = vld [vmem:[%s3202_s3 + $0x290] sm:$0xff]  ;;  %v2010_v18 = vpack.c.bf16 %v122_v12, %v115_v11  ;;  %v1980_v19 = vpack.c.bf16 %v120_v15, %v113_v14  ;;  %v129_v20 = vld [vmem:[%s3202_s3 + $0x260] sm:$0xff] }
  0x22   :  { %1961 = vmatpush1.bf16.msra.mxu1 %v1960_v35  ;;  %1963 = vmatprep.subr.bf16.mxu0 %v1962_v36  ;;  %v136_v21 = vld [vmem:[%s3202_s3 + $0x298] sm:$0xff]  ;;  %v1982_v22 = vpack.c.bf16 %v135_v17, %v128_v16  ;;  %v127_v23 = vld [vmem:[%s3202_s3 + $0x250] sm:$0xff]  ;;  %v134_v24 = vld [vmem:[%s3202_s3 + $0x288] sm:$0xff] }
  0x23   :  { %1995 = vmatprep.subr.bf16.mxu1 %v1994_v48  ;;  %v142_v25 = vld [vmem:[%s3202_s3 + $0x2c8] sm:$0xff]  ;;  %v149_v26 = vld [vmem:[%s3202_s3 + $0x300] sm:$0xff]  ;;  %v2014_v27 = vpack.c.bf16 %v136_v21, %v129_v20  ;;  %v1984_v28 = vpack.c.bf16 %v134_v24, %v127_v23  ;;  %v143_v29 = vld [vmem:[%s3202_s3 + $0x2d0] sm:$0xff] }
  0x24   :  { %230 = vmatmul.mubr.f32.vlgmr.msra.gmra.mrb[0].mxu0 %v2559_v41  ;;  %v150_v30 = vld [vmem:[%s3202_s3 + $0x308] sm:$0xff]  ;;  %v1986_v31 = vpack.c.bf16 %v149_v26, %v142_v25  ;;  %v141_v32 = vld [vmem:[%s3202_s3 + $0x2c0] sm:$0xff]  ;;  %v148_v33 = vld [vmem:[%s3202_s3 + $0x2f8] sm:$0xff] }
  0x25   :  { %307 = vmatmul.mubr.f32.vlgmr.msra.gmra.mrb[0].mxu1 %v2559_v41  ;;  %235 = vmatprep.mubr.f32.mxu0 %v2252_v7  ;;  %v156_v34 = vld [vmem:[%s3202_s3 + $0x338] sm:$0xff]  ;;  %v163_v35 = vld [vmem:[%s3202_s3 + $0x370] sm:$0xff]  ;;  %v2018_v36 = vpack.c.bf16 %v150_v30, %v143_v29 }
  0x26   :  { %312 = vmatprep.mubr.f32.mxu1 %v2252_v7  ;;  %1965 = vmatpush1.bf16.msra.mxu0 %v1964_v43 }
  0x27   :  { %1967 = vmatprep.subr.bf16.mxu0 %v1966_v46  ;;  %1997 = vmatpush3.bf16.msra.mxu1 %v1994_v48 }
  0x28   :  { %236 = vmatmul.mubr.f32.gmra.mrb[2].mxu0 %v2591_v53  ;;  %1999 = vmatprep.subr.bf16.mxu1 %v1998_v55 }
  0x29   :  { %313 = vmatmul.mubr.f32.gmra.mrb[2].mxu1 %v2591_v53  ;;  %383 = vmatprep.mubr.f32.mxu0 %v2252_v7 }
  0x2a   :  { %1969 = vmatpush1.bf16.msra.mxu0 %v1968_v54  ;;  %1809 = vmatprep.mubr.f32.mxu1 %v2559_v41 }
  0x2b   :  { %1971 = vmatprep.subr.bf16.mxu0 %v1970_v58  ;;  %2001 = vmatpush3.bf16.msra.mxu1 %v1998_v55 }
  0x2c   :  { %2003 = vmatprep.subr.bf16.mxu1 %v2002_v63 }
  0x2e   :  { %1973 = vmatpush1.bf16.msra.mxu0 %v1972_v0 }
  0x2f   :  { %1975 = vmatprep.subr.bf16.mxu0 %v1974_v3  ;;  %2005 = vmatpush3.bf16.msra.mxu1 %v2002_v63 }
  0x30   :  { %2007 = vmatprep.subr.bf16.mxu1 %v2006_v9 }
  0x32   :  { %1977 = vmatpush1.bf16.msra.mxu0 %v1976_v10 }
  0x33   :  { %1979 = vmatprep.subr.bf16.mxu0 %v1978_v13  ;;  %2009 = vmatpush3.bf16.msra.mxu1 %v2006_v9 }
  0x34   :  { %2011 = vmatprep.subr.bf16.mxu1 %v2010_v18 }
  0x36   :  { %1981 = vmatpush1.bf16.msra.mxu0 %v1980_v19 }
  0x37   :  { %1983 = vmatprep.subr.bf16.mxu0 %v1982_v22  ;;  %2013 = vmatpush3.bf16.msra.mxu1 %v2010_v18 }
  0x38   :  { %2015 = vmatprep.subr.bf16.mxu1 %v2014_v27 }
  0x39   :  { %20 = vsyncpa [#allocation3], 0  ;;  %v1988_v37 = vpack.c.bf16 %v148_v33, %v141_v32  ;;  %v157_v38 = vld [vmem:[%s3202_s3 + $0x340] sm:$0xff]  ;;  %v164_v39 = vld [vmem:[%s3202_s3 + $0x378] sm:$0xff]  ;;  %v1990_v40 = vpack.c.bf16 %v163_v35, %v156_v34  ;;  %vm695_vm0 = vcmask 64512   ;;  %vm741_vm1 = vcmask 261120  }
  0x3a   :  { %1985 = vmatpush1.bf16.msra.mxu0 %v1984_v28  ;;  %v155_v42 = vld [vmem:[%s3202_s3 + $0x330] sm:$0xff]  ;;  %v162_v43 = vld [vmem:[%s3202_s3 + $0x368] sm:$0xff]  ;;  %v495_v44 = vld [vmem:[%s3206_s7 + $0x80] sm:$0xff]  ;;  %v2022_v46 = vpack.c.bf16 %v164_v39, %v157_v38  ;;  %vm702_vm2 = vcmask 130112   ;;  %vm709_vm3 = vcmask 195712   ;;  %vm716_vm4 = vcmask 261312  }
  0x3b   :  { %1987 = vmatprep.subr.bf16.mxu0 %v1986_v31  ;;  %2017 = vmatpush3.bf16.msra.mxu1 %v2014_v27  ;;  %v496_v45 = vld [vmem:[%s3206_s7 + $0x88] sm:$0xff]  ;;  %v1992_v47 = vpack.c.bf16 %v162_v43, %v155_v42  ;;  %v527_v48 = vld [vmem:[%s3206_s7 + $0x180] sm:$0xff]  ;;  %v497_v54 = vld [vmem:[%s3206_s7 + $0x90] sm:$0xff]  ;;  %s2253_s19 = smov 120   ;;  %s2254_s28 = smov 32   ;;  %vm725_vm5 = vcmask 130048  }
  0x3c   :  { %2019 = vmatprep.subr.bf16.mxu1 %v2018_v36  ;;  %v528_v49 = vld [vmem:[%s3206_s7 + $0x188] sm:$0xff]  ;;  %v2026_v50 = vpack.c.bf16 %v496_v45, %v495_v44  ;;  %v479_v51 = vld [vmem:[%s3206_s7] sm:$0xff]  ;;  %v498_v55 = vld [vmem:[%s3206_s7 + $0x98] sm:$0xff]  ;;  %vm728_vm6 = vcmask 195584   ;;  %vm2256_vm7 = vmmov 0   ;;  %s2258_s16 = smov 96  }
  0x3d   :  { %v480_v52 = vld [vmem:[%s3206_s7 + $0x8] sm:$0xff]  ;;  %v2058_v56 = vpack.c.bf16 %v528_v49, %v527_v48  ;;  %v511_v57 = vld [vmem:[%s3206_s7 + $0x100] sm:$0xff]  ;;  %v529_v60 = vld [vmem:[%s3206_s7 + $0x190] sm:$0xff]  ;;  %v2030_v62 = vpack.c.bf16 %v498_v55, %v497_v54  ;;  %s2259_s1 = smov 1   ;;  %vm1536_vm8 = vcmask 7168   ;;  %vm1538_vm9 = vcmask 39936  }
  0x3e   :  { %1989 = vmatpush1.bf16.msra.mxu0 %v1988_v37  ;;  %v512_v58 = vld [vmem:[%s3206_s7 + $0x108] sm:$0xff]  ;;  %v2028_v59 = vpack.c.bf16 %v480_v52, %v479_v51  ;;  %v530_v61 = vld [vmem:[%s3206_s7 + $0x198] sm:$0xff]  ;;  %v481_v63 = vld [vmem:[%s3206_s7 + $0x10] sm:$0xff] }
  0x3f   :  { %1991 = vmatprep.subr.bf16.mxu0 %v1990_v40  ;;  %2021 = vmatpush3.bf16.msra.mxu1 %v2018_v36  ;;  %v482_v0 = vld [vmem:[%s3206_s7 + $0x18] sm:$0xff]  ;;  %v2060_v1 = vpack.c.bf16 %v512_v58, %v511_v57  ;;  %v499_v2 = vld [vmem:[%s3206_s7 + $0xa0] sm:$0xff]  ;;  %v500_v3 = vld [vmem:[%s3206_s7 + $0xa8] sm:$0xff]  ;;  %v2062_v4 = vpack.c.bf16 %v530_v61, %v529_v60 }
  0x40   :  { %2023 = vmatprep.subr.bf16.mxu1 %v2022_v46  ;;  %v513_v5 = vld [vmem:[%s3206_s7 + $0x110] sm:$0xff]  ;;  %v514_v6 = vld [vmem:[%s3206_s7 + $0x118] sm:$0xff]  ;;  %v2032_v8 = vpack.c.bf16 %v482_v0, %v481_v63  ;;  %v531_v9 = vld [vmem:[%s3206_s7 + $0x1a0] sm:$0xff]  ;;  %v2034_v11 = vpack.c.bf16 %v500_v3, %v499_v2 }
  0x41   :  { %v532_v10 = vld [vmem:[%s3206_s7 + $0x1a8] sm:$0xff]  ;;  %v483_v12 = vld [vmem:[%s3206_s7 + $0x20] sm:$0xff]  ;;  %v2064_v14 = vpack.c.bf16 %v514_v6, %v513_v5  ;;  %v501_v15 = vld [vmem:[%s3206_s7 + $0xb0] sm:$0xff] }
  0x42   :  { %1993 = vmatpush1.bf16.msra.mxu0 %v1992_v47  ;;  %v484_v13 = vld [vmem:[%s3206_s7 + $0x28] sm:$0xff]  ;;  %v502_v16 = vld [vmem:[%s3206_s7 + $0xb8] sm:$0xff]  ;;  %v2066_v17 = vpack.c.bf16 %v532_v10, %v531_v9  ;;  %v515_v18 = vld [vmem:[%s3206_s7 + $0x120] sm:$0xff] }
  0x43   :  { %2027 = vmatprep.subr.bf16.mxu0 %v2026_v50  ;;  %2025 = vmatpush3.bf16.msra.mxu1 %v2022_v46  ;;  %v516_v19 = vld [vmem:[%s3206_s7 + $0x128] sm:$0xff]  ;;  %v2036_v20 = vpack.c.bf16 %v484_v13, %v483_v12  ;;  %v533_v21 = vld [vmem:[%s3206_s7 + $0x1b0] sm:$0xff]  ;;  %v534_v22 = vld [vmem:[%s3206_s7 + $0x1b8] sm:$0xff]  ;;  %v2038_v23 = vpack.c.bf16 %v502_v16, %v501_v15 }
  0x44   :  { %2059 = vmatprep.subr.bf16.mxu1 %v2058_v56  ;;  %v485_v24 = vld [vmem:[%s3206_s7 + $0x30] sm:$0xff]  ;;  %v486_v25 = vld [vmem:[%s3206_s7 + $0x38] sm:$0xff]  ;;  %v2068_v26 = vpack.c.bf16 %v516_v19, %v515_v18  ;;  %v503_v27 = vld [vmem:[%s3206_s7 + $0xc0] sm:$0xff]  ;;  %v2070_v29 = vpack.c.bf16 %v534_v22, %v533_v21 }
  0x45   :  { %384 = vmatmul.mubr.f32.vlgmr.msra.gmra.mrb[4].mxu0 %v2559_v41  ;;  %v504_v28 = vld [vmem:[%s3206_s7 + $0xc8] sm:$0xff]  ;;  %v517_v30 = vld [vmem:[%s3206_s7 + $0x130] sm:$0xff]  ;;  %v518_v31 = vld [vmem:[%s3206_s7 + $0x138] sm:$0xff]  ;;  %v2040_v32 = vpack.c.bf16 %v486_v25, %v485_v24 }
  0x46   :  { %389 = vmatprep.mubr.f32.mxu0 %v2252_v7  ;;  %2029 = vmatpush3.bf16.msra.mxu0 %v2028_v59  ;;  %v535_v33 = vld [vmem:[%s3206_s7 + $0x1c0] sm:$0xff]  ;;  %v536_v34 = vld [vmem:[%s3206_s7 + $0x1c8] sm:$0xff]  ;;  %v2042_v35 = vpack.c.bf16 %v504_v28, %v503_v27  ;;  %v2072_v38 = vpack.c.bf16 %v518_v31, %v517_v30  ;;  %v505_v39 = vld [vmem:[%s3206_s7 + $0xd0] sm:$0xff] }
  0x47   :  { %1810 = vmatmul.mubr.f32.vlgmr.msra.gmra.mrb[4].mxu1 %v2591_v53  ;;  %2031 = vmatprep.subr.bf16.mxu0 %v2030_v62  ;;  %v487_v36 = vld [vmem:[%s3206_s7 + $0x40] sm:$0xff]  ;;  %v488_v37 = vld [vmem:[%s3206_s7 + $0x48] sm:$0xff]  ;;  %v506_v40 = vld [vmem:[%s3206_s7 + $0xd8] sm:$0xff]  ;;  %v2074_v42 = vpack.c.bf16 %v536_v34, %v535_v33 }
  0x48   :  { %2061 = vmatpush3.bf16.msra.mxu1 %v2060_v1  ;;  %v519_v43 = vld [vmem:[%s3206_s7 + $0x140] sm:$0xff]  ;;  %v520_v44 = vld [vmem:[%s3206_s7 + $0x148] sm:$0xff]  ;;  %v2044_v45 = vpack.c.bf16 %v488_v37, %v487_v36  ;;  %v537_v46 = vld [vmem:[%s3206_s7 + $0x1d0] sm:$0xff]  ;;  %v2046_v48 = vpack.c.bf16 %v506_v40, %v505_v39 }
  0x49   :  { %390 = vmatmul.mubr.f32.gmra.mrb[6].mxu0 %v2591_v53  ;;  %2063 = vmatprep.subr.bf16.mxu1 %v2062_v4  ;;  %v538_v47 = vld [vmem:[%s3206_s7 + $0x1d8] sm:$0xff]  ;;  %v489_v49 = vld [vmem:[%s3206_s7 + $0x50] sm:$0xff]  ;;  %v2076_v51 = vpack.c.bf16 %v520_v44, %v519_v43  ;;  %v507_v52 = vld [vmem:[%s3206_s7 + $0xe0] sm:$0xff] }
  0x4a   :  { %2033 = vmatpush3.bf16.msra.mxu0 %v2032_v8  ;;  %v490_v50 = vld [vmem:[%s3206_s7 + $0x58] sm:$0xff]  ;;  %v508_v54 = vld [vmem:[%s3206_s7 + $0xe8] sm:$0xff]  ;;  %v2078_v55 = vpack.c.bf16 %v538_v47, %v537_v46  ;;  %v521_v56 = vld [vmem:[%s3206_s7 + $0x150] sm:$0xff] }
  0x4b   :  { %2035 = vmatprep.subr.bf16.mxu0 %v2034_v11  ;;  %v522_v57 = vld [vmem:[%s3206_s7 + $0x158] sm:$0xff]  ;;  %v2048_v58 = vpack.c.bf16 %v490_v50, %v489_v49  ;;  %v539_v59 = vld [vmem:[%s3206_s7 + $0x1e0] sm:$0xff]  ;;  %v540_v60 = vld [vmem:[%s3206_s7 + $0x1e8] sm:$0xff]  ;;  %v2050_v61 = vpack.c.bf16 %v508_v54, %v507_v52 }
  0x4c   :  { %2065 = vmatpush3.bf16.msra.mxu1 %v2064_v14  ;;  %v491_v62 = vld [vmem:[%s3206_s7 + $0x60] sm:$0xff]  ;;  %v492_v63 = vld [vmem:[%s3206_s7 + $0x68] sm:$0xff]  ;;  %v2080_v0 = vpack.c.bf16 %v522_v57, %v521_v56  ;;  %v2082_v1 = vpack.c.bf16 %v540_v60, %v539_v59  ;;  %v509_v6 = vld [vmem:[%s3206_s7 + $0xf0] sm:$0xff] }
  0x4d   :  { %2067 = vmatprep.subr.bf16.mxu1 %v2066_v17  ;;  %v523_v2 = vld [vmem:[%s3206_s7 + $0x160] sm:$0xff]  ;;  %v524_v3 = vld [vmem:[%s3206_s7 + $0x168] sm:$0xff]  ;;  %v2052_v4 = vpack.c.bf16 %v492_v63, %v491_v62  ;;  %v510_v8 = vld [vmem:[%s3206_s7 + $0xf8] sm:$0xff] }
  0x4e   :  { %2037 = vmatpush3.bf16.msra.mxu0 %v2036_v20  ;;  %v2084_v5 = vpack.c.bf16 %v524_v3, %v523_v2  ;;  %v541_v9 = vld [vmem:[%s3206_s7 + $0x1f0] sm:$0xff]  ;;  %v2054_v10 = vpack.c.bf16 %v510_v8, %v509_v6  ;;  %v542_v11 = vld [vmem:[%s3206_s7 + $0x1f8] sm:$0xff]  ;;  %v869_v19 = vld [vmem:[%s3204_s5 + $0x80] sm:$0xff]  ;;  %v835_v2 = vlaneseq }
  0x4f   :  { %2039 = vmatprep.subr.bf16.mxu0 %v2038_v23  ;;  %v493_v12 = vld [vmem:[%s3206_s7 + $0x70] sm:$0xff]  ;;  %v494_v13 = vld [vmem:[%s3206_s7 + $0x78] sm:$0xff]  ;;  %v2086_v14 = vpack.c.bf16 %v542_v11, %v541_v9  ;;  %v870_v20 = vld [vmem:[%s3204_s5 + $0x88] sm:$0xff] }
  0x50   :  { %2069 = vmatpush3.bf16.msra.mxu1 %v2068_v26  ;;  %v2056_v15 = vpack.c.bf16 %v494_v13, %v493_v12  ;;  %v525_v16 = vld [vmem:[%s3206_s7 + $0x170] sm:$0xff]  ;;  %v526_v17 = vld [vmem:[%s3206_s7 + $0x178] sm:$0xff]  ;;  %v2098_v21 = vpack.c.bf16 %v870_v20, %v869_v19  ;;  %v853_v23 = vld [vmem:[%s3204_s5] sm:$0xff]  ;;  %vm1564_vm11 = vcmp.lt.s32.totalorder %v835_v2, 144 }
  0x51   :  { %2071 = vmatprep.subr.bf16.mxu1 %v2070_v29  ;;  %v2088_v18 = vpack.c.bf16 %v526_v17, %v525_v16  ;;  %v854_v24 = vld [vmem:[%s3204_s5 + $0x8] sm:$0xff]  ;;  %v871_v27 = vld [vmem:[%s3204_s5 + $0x90] sm:$0xff]  ;;  %v872_v28 = vld [vmem:[%s3204_s5 + $0x98] sm:$0xff] }
  0x52   :  { %2041 = vmatpush3.bf16.msra.mxu0 %v2040_v32  ;;  %v2100_v33 = vpack.c.bf16 %v854_v24, %v853_v23  ;;  %v2102_v36 = vpack.c.bf16 %v872_v28, %v871_v27  ;;  %v855_v37 = vld [vmem:[%s3204_s5 + $0x10] sm:$0xff]  ;;  %v857_v50 = vld [vmem:[%s3204_s5 + $0x20] sm:$0xff]  ;;  %v860_v57 = vld [vmem:[%s3204_s5 + $0x38] sm:$0xff] }
  0x53   :  { %2043 = vmatprep.subr.bf16.mxu0 %v2042_v35  ;;  %v875_v52 = vld [vmem:[%s3204_s5 + $0xb0] sm:$0xff]  ;;  %v878_v59 = vld [vmem:[%s3204_s5 + $0xc8] sm:$0xff]  ;;  %v861_v62 = vld [vmem:[%s3204_s5 + $0x40] sm:$0xff] }
  0x54   :  { %2073 = vmatpush3.bf16.msra.mxu1 %v2072_v38  ;;  %v856_v38 = vld [vmem:[%s3204_s5 + $0x18] sm:$0xff]  ;;  %v859_v56 = vld [vmem:[%s3204_s5 + $0x30] sm:$0xff]  ;;  %v862_v63 = vld [vmem:[%s3204_s5 + $0x48] sm:$0xff] }
  0x55   :  { %2075 = vmatprep.subr.bf16.mxu1 %v2074_v42  ;;  %v873_v42 = vld [vmem:[%s3204_s5 + $0xa0] sm:$0xff]  ;;  %v2104_v47 = vpack.c.bf16 %v856_v38, %v855_v37  ;;  %v2112_v60 = vpack.c.bf16 %v860_v57, %v859_v56  ;;  %v2116_v3 = vpack.c.bf16 %v862_v63, %v861_v62  ;;  %v864_v6 = vld [vmem:[%s3204_s5 + $0x58] sm:$0xff]  ;;  %v882_v9 = vld [vmem:[%s3204_s5 + $0xe8] sm:$0xff] }
  0x56   :  { %2045 = vmatpush3.bf16.msra.mxu0 %v2044_v45  ;;  %v881_v8 = vld [vmem:[%s3204_s5 + $0xe0] sm:$0xff]  ;;  %v884_v16 = vld [vmem:[%s3204_s5 + $0xf8] sm:$0xff]  ;;  %vm2186_vm10 = vmpackc.low %vm695_vm0, %vm695_vm0 }
  0x57   :  { %2047 = vmatprep.subr.bf16.mxu0 %v2046_v48  ;;  %v2122_v12 = vpack.c.bf16 %v882_v9, %v881_v8  ;;  %v865_v13 = vld [vmem:[%s3204_s5 + $0x60] sm:$0xff]  ;;  %v868_v23 = vld [vmem:[%s3204_s5 + $0x78] sm:$0xff] }
  0x58   :  { %2077 = vmatpush3.bf16.msra.mxu1 %v2076_v51  ;;  %v858_v51 = vld [vmem:[%s3204_s5 + $0x28] sm:$0xff] }
  0x59   :  { %2079 = vmatprep.subr.bf16.mxu1 %v2078_v55  ;;  %v2108_v54 = vpack.c.bf16 %v858_v51, %v857_v50 }
  0x5a   :  { %2049 = vmatpush3.bf16.msra.mxu0 %v2048_v58  ;;  %v877_v58 = vld [vmem:[%s3204_s5 + $0xc0] sm:$0xff] }
  0x5b   :  { %2051 = vmatprep.subr.bf16.mxu0 %v2050_v61  ;;  %v2114_v61 = vpack.c.bf16 %v878_v59, %v877_v58 }
  0x5c   :  { %2081 = vmatpush3.bf16.msra.mxu1 %v2080_v0  ;;  %v879_v0 = vld [vmem:[%s3204_s5 + $0xd0] sm:$0xff] }
  0x5d   :  { %2083 = vmatprep.subr.bf16.mxu1 %v2082_v1  ;;  %v880_v1 = vld [vmem:[%s3204_s5 + $0xd8] sm:$0xff] }
  0x5e   :  { %2053 = vmatpush3.bf16.msra.mxu0 %v2052_v4  ;;  %v2118_v4 = vpack.c.bf16 %v880_v1, %v879_v0 }
  0x5f   :  { %2055 = vmatprep.subr.bf16.mxu0 %v2054_v10  ;;  %v2983_v10 = vshrl.u32 %v835_v2, 7 }
  0x60   :  { %2085 = vmatpush3.bf16.msra.mxu1 %v2084_v5  ;;  %v863_v5 = vld [vmem:[%s3204_s5 + $0x50] sm:$0xff] }
  0x61   :  { %2087 = vmatprep.subr.bf16.mxu1 %v2086_v14  ;;  %v2120_v11 = vpack.c.bf16 %v864_v6, %v863_v5  ;;  %v866_v14 = vld [vmem:[%s3204_s5 + $0x68] sm:$0xff]  ;;  %v837_v17 = vsub.s32 0, %v2983_v10  ;;  %v841_v20 = vsub.s32 1, %v2983_v10 }
  0x62   :  { %2057 = vmatpush3.bf16.msra.mxu0 %v2056_v15  ;;  %v883_v15 = vld [vmem:[%s3204_s5 + $0xf0] sm:$0xff]  ;;  %v2124_v19 = vpack.c.bf16 %v866_v14, %v865_v13 }
  0x64   :  { %2089 = vmatpush3.bf16.msra.mxu1 %v2088_v18  ;;  %v833_v18 = vld [vmem:[%s3203_s4] sm:$0x3] }
  0x65   :  { %2099 = vmatprep.subr.bf16.mxu1 %v2098_v21  ;;  %v2126_v21 = vpack.c.bf16 %v884_v16, %v883_v15  ;;  %v838_v24 = vrot.slane %v833_v18, %v837_v17 }
  0xf7   :  { %v231_v22 = vpop.f32.mrb[0].mxu0 }
  0xf8   :  { %v308_v25 = vpop.f32.mrb[0].mxu1  ;;  %v233_v26 = vpop.f32.mrb[1].mxu0  ;;  %v471_v31 = vmul.f32 %v231_v22, %v2559_v41  ;;  %v867_v22 = vld [vmem:[%s3204_s5 + $0x70] sm:$0xff] }
  0xf9   :  { %v472_v29 = vmul.f32 %v233_v26, %v2559_v41  ;;  %v310_v30 = vpop.f32.mrb[1].mxu1  ;;  %v473_v34 = vmul.f32 %v308_v25, %v2559_v41  ;;  %v842_v25 = vrot.slane %v833_v18, %v841_v20  ;;  %v2128_v26 = vpack.c.bf16 %v868_v23, %v867_v22  ;;  %v737_v20 = vld [vmem:[%s3207_s8] sm:$0xff] }
  0xfa   :  { %v474_v32 = vmul.f32 %v310_v30, %v2559_v41  ;;  %v874_v41 = vld [vmem:[%s3204_s5 + $0xa8] sm:$0xff]  ;;  %v1588_v23 = vld [vmem:[%s3212_s13] ss:$0 sm:$0xff] }
  0xfb   :  { %v237_v35 = vpop.f32.mrb[2].mxu0  ;;  %607 = vmatprep.mubr.f32.mxu0 %v472_v29  ;;  %v2106_v49 = vpack.c.bf16 %v874_v41, %v873_v42 }
  0xfc   :  { %v314_v39 = vpop.f32.mrb[2].mxu1  ;;  %682 = vmatprep.mubr.f32.mxu1 %v474_v32  ;;  %v239_v40 = vpop.f32.mrb[3].mxu0  ;;  %608 = vmatmul.mubr.f32.vlgmr.msra.gmra.mrb[8].mxu0 %v471_v31  ;;  %v475_v45 = vmul.f32 %v237_v35, %v2591_v53 }
  0xfd   :  { %v476_v43 = vmul.f32 %v239_v40, %v2591_v53  ;;  %v316_v44 = vpop.f32.mrb[3].mxu1  ;;  %683 = vmatmul.mubr.f32.vlgmr.msra.gmra.mrb[6].mxu1 %v473_v34  ;;  %v477_v48 = vmul.f32 %v314_v39, %v2591_v53 }
  0xfe   :  { %v478_v46 = vmul.f32 %v316_v44, %v2591_v53  ;;  %2101 = vmatpush3.bf16.msra.mxu1 %v2100_v33  ;;  %v876_v53 = vld [vmem:[%s3204_s5 + $0xb8] sm:$0xff] }
  0xff   :  { %612 = vmatprep.mubr.f32.mxu0 %v476_v43  ;;  %2103 = vmatprep.subr.bf16.mxu1 %v2102_v36  ;;  %v2110_v55 = vpack.c.bf16 %v876_v53, %v875_v52 }
 0x100   :  { %687 = vmatprep.mubr.f32.mxu1 %v478_v46  ;;  %613 = vmatmul.mubr.f32.gmra.mrb[10].mxu0 %v475_v45 }
 0x101   :  { %688 = vmatmul.mubr.f32.gmra.mrb[8].mxu1 %v477_v48 }
 0x102   :  { %2105 = vmatpush3.bf16.msra.mxu1 %v2104_v47 }
 0x103   :  { %2107 = vmatprep.subr.bf16.mxu1 %v2106_v49 }
 0x106   :  { %2109 = vmatpush3.bf16.msra.mxu1 %v2108_v54 }
 0x107   :  { %2111 = vmatprep.subr.bf16.mxu1 %v2110_v55 }
 0x10a   :  { %2113 = vmatpush3.bf16.msra.mxu1 %v2112_v60 }
 0x10b   :  { %2115 = vmatprep.subr.bf16.mxu1 %v2114_v61 }
 0x10e   :  { %2117 = vmatpush3.bf16.msra.mxu1 %v2116_v3 }
 0x10f   :  { %2119 = vmatprep.subr.bf16.mxu1 %v2118_v4 }
 0x112   :  { %2121 = vmatpush3.bf16.msra.mxu1 %v2120_v11 }
 0x113   :  { %2123 = vmatprep.subr.bf16.mxu1 %v2122_v12  ;;  %v1583_v12 = vld [vmem:[%s3205_s6] ss:$0 sm:$0xff] }
 0x116   :  { %2125 = vmatpush3.bf16.msra.mxu1 %v2124_v19 }
 0x117   :  { %2127 = vmatprep.subr.bf16.mxu1 %v2126_v21  ;;  %v738_v21 = vld [vmem:[%s3207_s8 + $0x8] sm:$0xff] }
 0x118   :  { %v385_v27 = vpop.f32.mrb[4].mxu0  ;;  %v2090_v22 = vpack.c.bf16 %v738_v21, %v737_v20  ;;  %v1209_v20 = vld [vmem:[%s3210_s11 + $0x8] sm:$0xff] }
 0x119   :  { %v845_v28 = vadd.f32 %v838_v24, %v385_v27  ;;  %v387_v29 = vpop.f32.mrb[5].mxu0 }
 0x11a   :  { %v846_v30 = vadd.f32 %v842_v25, %v387_v29  ;;  %2129 = vmatpush3.bf16.msra.mxu1 %v2128_v26  ;;  %v3008_v31 = vpop.f32.mrb[4].mxu1  ;;  %2091 = vmatprep.subr.bf16.mxu0 %v2090_v22 }
 0x11b   :  { %v849_v32 = vmax.f32 %v845_v28, 0.0  ;;  %v3010_v33 = vpop.f32.mrb[5].mxu1  ;;  %2093 = vmatpush3.bf16.msra.mxu0 %v2090_v22 }
 0x11c   :  { %v850_v34 = vmax.f32 %v846_v30, 0.0  ;;  %v391_v35 = vpop.f32.mrb[6].mxu0 }
 0x11d   :  { %v847_v36 = vadd.f32 %v838_v24, %v391_v35  ;;  %v393_v37 = vpop.f32.mrb[7].mxu0  ;;  %v739_v24 = vld [vmem:[%s3207_s8 + $0x10] sm:$0xff] }
 0x11e   :  { %v848_v38 = vadd.f32 %v842_v25, %v393_v37  ;;  %956 = vmatprep.mubr.f32.mxu1 %v850_v34  ;;  %v740_v25 = vld [vmem:[%s3207_s8 + $0x18] sm:$0xff] }
 0x11f   :  { %v851_v39 = vmax.f32 %v847_v36, 0.0  ;;  %957 = vmatmul.mubr.f32.vlgmr.msra.gmra.mrb[10].mxu1 %v849_v32  ;;  %v2094_v26 = vpack.c.bf16 %v740_v25, %v739_v24 }
 0x120   :  { %v852_v40 = vmax.f32 %v848_v38, 0.0 }
 0x121   :  { %2095 = vmatprep.subr.bf16.mxu0 %v2094_v26 }
 0x122   :  { %961 = vmatprep.mubr.f32.mxu1 %v852_v40  ;;  %2097 = vmatpush3.bf16.msra.mxu0 %v2094_v26 }
 0x123   :  { %962 = vmatmul.mubr.f32.gmra.mrb[12].mxu1 %v851_v39 }
 0x1cf   :  { %v1651_v42 = vpop.f32.mrb[8].mxu0 }
 0x1d0   :  { %v1689_v41 = vpop.f32.mrb[6].mxu1  ;;  %v1652_v43 = vpop.f32.mrb[9].mxu0 }
 0x1d1   :  { %v1653_v44 = vadd.f32 %v1652_v43, %v1651_v42  ;;  %v1690_v45 = vpop.f32.mrb[7].mxu1 }
 0x1d2   :  { %v1691_v46 = vadd.f32 %v1690_v45, %v1689_v41 }
 0x1d3   :  { %v1654_v47 = vpop.f32.mrb[10].mxu0 }
 0x1d4   :  { %v685_v48 = vadd.f32 %v1691_v46, %v1653_v44  ;;  %v1692_v49 = vpop.f32.mrb[8].mxu1  ;;  %v1655_v50 = vpop.f32.mrb[11].mxu0 }
 0x1d5   :  { %v1656_v51 = vadd.f32 %v1655_v50, %v1654_v47  ;;  %v1693_v52 = vpop.f32.mrb[9].mxu1  ;;  %v980_v50 = vld [vmem:[%s3208_s9 + $0x8] sm:$0xff] }
 0x1d6   :  { %v3012_v53 = vmul.f32 0.088388346, %v685_v48  ;;  %v1694_v54 = vadd.f32 %v1693_v52, %v1692_v49  ;;  %v1064_v55 = vmul.f32 %v685_v48, %v685_v48  ;;  %v979_v49 = vld [vmem:[%s3208_s9] sm:$0xff]  ;;  %v981_v52 = vld [vmem:[%s3208_s9 + $0x10] sm:$0xff] }
 0x1d8   :  { %v690_v56 = vadd.f32 %v1694_v54, %v1656_v51  ;;  %v696_v57 = vsel %vm695_vm0, %v3012_v53, -inf  ;;  %v1066_v60 = vsel %vm741_vm1, %v1064_v55, 0.0  ;;  %v703_v63 = vsel %vm702_vm2, %v3012_v53, -inf }
 0x1d9   :  { %697 = vmax.xlane.f32.xlu0 %v696_v57  ;;  %v710_v3 = vsel %vm709_vm3, %v3012_v53, -inf  ;;  %v717_v5 = vsel %vm716_vm4, %v3012_v53, -inf  ;;  %v2130_v51 = vpack.c.bf16 %v980_v50, %v979_v49  ;;  %v2255_v55 = vmov 0.0|0.0   ;;  %v1216_v50 = vld [vmem:[%s3210_s11 + $0x40] sm:$0xff] }
 0x1da   :  { %v3016_v58 = vmul.f32 0.088388346, %v690_v56  ;;  %v1065_v59 = vmul.f32 %v690_v56, %v690_v56 }
 0x1db   :  { %2131 = vmatprep.subr.bf16.mxu0 %v2130_v51  ;;  %2177 = vmatprep.subr.bf16.mxu1 %v2130_v51 }
 0x1dc   :  { %v1067_v61 = vsel %vm741_vm1, %v1065_v59, 0.0  ;;  %v699_v62 = vsel %vm695_vm0, %v3016_v58, -inf  ;;  %v706_v1 = vsel %vm702_vm2, %v3016_v58, -inf  ;;  %v713_v4 = vsel %vm709_vm3, %v3016_v58, -inf  ;;  %2179 = vmatpush3.bf16.msra.mxu1 %v2130_v51 }
 0x1dd   :  { %v3023_v0 = vadd.f32 %v1067_v61, %v1066_v60  ;;  %700 = vmax.xlane.f32.xlu1 %v699_v62  ;;  %704 = vmax.xlane.f32.xlu0 %v703_v63  ;;  %v720_v6 = vsel %vm716_vm4, %v3016_v58, -inf }
 0x1e1   :  { %707 = vmax.xlane.f32.xlu1 %v706_v1  ;;  %711 = vmax.xlane.f32.xlu0 %v710_v3 }
 0x1e5   :  { %714 = vmax.xlane.f32.xlu1 %v713_v4  ;;  %718 = vmax.xlane.f32.xlu0 %v717_v5  ;;  %v1095_v5 = vld [vmem:[%s3209_s10] sm:$0xff] }
 0x1e9   :  { %721 = vmax.xlane.f32.xlu1 %v720_v6  ;;  %v1096_v6 = vld [vmem:[%s3209_s10 + $0x8] sm:$0xff] }
 0x1f2   :  { %v1733_v8 = vpop.f32.mrb[10].mxu1 }
 0x1f3   :  { %v1734_v9 = vpop.f32.mrb[11].mxu1 }
 0x1f4   :  { %v1735_v11 = vadd.f32 %v1734_v9, %v1733_v8 }
 0x1f6   :  { %v959_v13 = vadd.f32 %v1735_v11, %v1583_v12  ;;  %v1736_v14 = vpop.f32.mrb[12].mxu1 }
 0x1f7   :  { %v1737_v15 = vpop.f32.mrb[13].mxu1 }
 0x1f8   :  { %v967_v16 = vand.u32 2147483647, %v959_v13  ;;  %v1738_v17 = vadd.f32 %v1737_v15, %v1736_v14  ;;  %v2139_v15 = vpack.c.bf16 %v1096_v6, %v1095_v5 }
 0x1fa   :  { %v964_v18 = vadd.f32 %v1738_v17, %v1583_v12  ;;  %v1097_v17 = vld [vmem:[%s3209_s10 + $0x10] sm:$0xff] }
 0x1fb   :  { %971 = vrot.lane.b32.xlu0 %v967_v16, %s2253_s19 }
 0x1fc   :  { %v968_v19 = vand.u32 2147483647, %v964_v18  ;;  %v1098_v18 = vld [vmem:[%s3209_s10 + $0x18] sm:$0xff] }
 0x1fd   :  { %v2142_v21 = vpack.c.bf16 %v1098_v18, %v1097_v17  ;;  %v1589_v18 = vld [vmem:[%s3213_s14] ss:$0 sm:$0xff] }
 0x1fe   :  { %973 = vrot.lane.b32.xlu1 %v968_v19, %s2253_s19  ;;  %v1208_v19 = vld [vmem:[%s3210_s11] sm:$0xff] }
 0x1ff   :  { %v2144_v22 = vpack.c.bf16 %v1209_v20, %v1208_v19 }
 0x202   :  { %1201 = vrot.lane.b32.xlu1 %v1588_v23, %s2254_s28 }
 0x266   :  { %v698_v27 = vpop.xlane.xlu0 %697 }
 0x26a   :  { %v701_v28 = vpop.xlane.xlu1 %700  ;;  %v705_v29 = vpop.xlane.xlu0 %704 }
 0x26b   :  { %v723_v34 = vsel %vm695_vm0, %v698_v27, %v705_v29 }
 0x26e   :  { %v708_v30 = vpop.xlane.xlu1 %707  ;;  %v712_v32 = vpop.xlane.xlu0 %711 }
 0x26f   :  { %v726_v35 = vsel %vm725_vm5, %v723_v34, %v712_v32  ;;  %v724_v40 = vsel %vm695_vm0, %v701_v28, %v708_v30 }
 0x272   :  { %v715_v36 = vpop.xlane.xlu1 %714  ;;  %v719_v37 = vpop.xlane.xlu0 %718 }
 0x273   :  { %v729_v38 = vsel %vm728_vm6, %v726_v35, %v719_v37  ;;  %v727_v42 = vsel %vm725_vm5, %v724_v40, %v715_v36 }
 0x274   :  { %v731_v39 = vsub.f32 %v3012_v53, %v729_v38  ;;  %v982_v53 = vld [vmem:[%s3208_s9 + $0x18] sm:$0xff]  ;;  %v1210_v38 = vld [vmem:[%s3210_s11 + $0x10] sm:$0xff] }
 0x275   :  { %v2134_v54 = vpack.c.bf16 %v982_v53, %v981_v52  ;;  %v1218_v53 = vld [vmem:[%s3210_s11 + $0x50] sm:$0xff] }
 0x276   :  { %v733_v41 = vmul.f32 1.442695, %v731_v39  ;;  %v722_v43 = vpop.xlane.xlu1 %721  ;;  %v972_v9 = vpop.permute.xlu0 %971  ;;  %v1211_v39 = vld [vmem:[%s3210_s11 + $0x18] sm:$0xff] }
 0x277   :  { %v730_v44 = vsel %vm728_vm6, %v727_v42, %v722_v43  ;;  %2181 = vmatprep.subr.bf16.mxu1 %v2134_v54  ;;  %v1206_v43 = vld [vmem:[%s3201_s2] sm:$0xff] }
 0x278   :  { %2200 = vpow2.f32 %v733_v41  ;;  %v732_v45 = vsub.f32 %v3016_v58, %v730_v44  ;;  %2183 = vmatpush3.bf16.msra.mxu1 %v2134_v54  ;;  %v2148_v41 = vpack.c.bf16 %v1211_v39, %v1210_v38  ;;  %v1212_v44 = vld [vmem:[%s3210_s11 + $0x20] sm:$0xff]  ;;  %v1173_v39 = vld [vmem:[%s3199_s0 + $0x8] sm:$0xff] }
 0x279   :  { %2184 = vmatprep.subr.bf16.mxu1 %v2255_v55  ;;  %v1172_v38 = vld [vmem:[%s3199_s0] sm:$0xff]  ;;  %s2260_s0 = smov 16  }
 0x27a   :  { %v735_v46 = vmul.f32 1.442695, %v732_v45  ;;  %v974_v12 = vpop.permute.xlu1 %973  ;;  %v1213_v45 = vld [vmem:[%s3210_s11 + $0x28] sm:$0xff] }
 0x27c   :  { %2202 = vpow2.f32 %v735_v46  ;;  %v2152_v46 = vpack.c.bf16 %v1213_v45, %v1212_v44 }
 0x282   :  { %v2201_v47 = vpop.eup %2200 }
 0x283   :  { %1820 = vmatprep.mubr.msk.f32.mxu0 %vm741_vm1, %v2201_v47 }
 0x286   :  { %v2203_v48 = vpop.eup %2202 }
 0x287   :  { %1821 = vmatmul.mubr.msk.f32.vlgmr.msra.gmra.mrb[12].mxu0 %vm741_vm1, %v2203_v48 }
 0x288   :  { %2133 = vmatpush3.bf16.msra.mxu0 %v2130_v51  ;;  %v1217_v51 = vld [vmem:[%s3210_s11 + $0x48] sm:$0xff] }
 0x289   :  { %2135 = vmatprep.subr.bf16.mxu0 %v2134_v54  ;;  %v2160_v52 = vpack.c.bf16 %v1217_v51, %v1216_v50 }
 0x28c   :  { %2137 = vmatpush3.bf16.msra.mxu0 %v2134_v54  ;;  %v1219_v54 = vld [vmem:[%s3210_s11 + $0x58] sm:$0xff] }
 0x28d   :  { %2138 = vmatprep.subr.bf16.mxu0 %v2255_v55 }
 0x35a   :  { %v1822_v56 = vpop.f32.mrb[12].mxu0 }
 0x35b   :  { %2204 = vrcp.f32 %v1822_v56  ;;  %v814_v57 = vpop.f32.mrb[13].mxu0 }
 0x35c   :  { %2206 = vrcp.f32 %v814_v57 }
 0x365   :  { %v2205_v58 = vpop.eup %2204 }
 0x366   :  { %v2207_v59 = vpop.eup %2206  ;;  %v826_v60 = vmul.f32 %v2205_v58, %v1822_v56  ;;  %v1220_v56 = vld [vmem:[%s3210_s11 + $0x60] sm:$0xff] }
 0x367   :  { %v825_v61 = vmul.f32 %v2207_v59, %v814_v57  ;;  %v1221_v57 = vld [vmem:[%s3210_s11 + $0x68] sm:$0xff] }
 0x368   :  { %v828_v62 = vsub.f32 2.0, %v826_v60  ;;  %v1223_v60 = vld [vmem:[%s3210_s11 + $0x78] sm:$0xff] }
 0x369   :  { %v827_v63 = vsub.f32 2.0, %v825_v61 }
 0x36a   :  { %v830_v1 = vmul.f32 %v2205_v58, %v828_v62  ;;  %v2168_v58 = vpack.c.bf16 %v1221_v57, %v1220_v56  ;;  %v1207_v62 = vld [vmem:[%s3201_s2 + $0x8] sm:$0xff]  ;;  %s2257_s2 = smov 64  }
 0x36b   :  { %v829_v3 = vmul.f32 %v2207_v59, %v827_v63  ;;  %v1222_v59 = vld [vmem:[%s3210_s11 + $0x70] sm:$0xff] }
 0x36c   :  { %v832_v4 = vmul.f32 %v2203_v48, %v830_v1  ;;  %v1215_v48 = vld [vmem:[%s3210_s11 + $0x38] sm:$0xff]  ;;  %v2172_v61 = vpack.c.bf16 %v1223_v60, %v1222_v59 }
 0x36d   :  { %v831_v8 = vmul.f32 %v2201_v47, %v829_v3  ;;  %v1214_v47 = vld [vmem:[%s3210_s11 + $0x30] sm:$0xff]  ;;  %v1202_v3 = vpop.permute.xlu1 %1201 }
 0x36e   :  { %v1079_v11 = vadd.f32 1e-08, %v832_v4  ;;  %v978_v16 = vmul.f32 %v974_v12, %v832_v4  ;;  %v2156_v49 = vpack.c.bf16 %v1215_v48, %v1214_v47  ;;  %v1204_v5 = vadd.f32 %v1202_v3, %v3010_v33  ;;  %v1587_v47 = vld [vmem:[%s3211_s12] ss:$0 sm:$0xff]  ;;  %s2263_s12 = smov [#allocation2]  }
 0x36f   :  { %v1078_v13 = vadd.f32 1e-08, %v831_v8  ;;  %v977_v14 = vmul.f32 %v972_v9, %v831_v8  ;;  %v1205_v9 = vadd.f32 %v3008_v31, %v1202_v3  ;;  %v1193_v48 = vadd.f32 %v1587_v47, %v3010_v33 }
 0x370   :  { %2208 = vlog2.f32 %v1079_v11 }
 0x371   :  { %2210 = vlog2.f32 %v1078_v13  ;;  %1831 = vmatprep.mubr.msk.f32.mxu0 %vm741_vm1, %v977_v14  ;;  %v1591_v11 = vmul.f32 -1.442695, %v1205_v9  ;;  %v1320_v50 = vand.u32 2147483647, %v1193_v48 }
 0x372   :  { %1832 = vmatmul.mubr.msk.f32.vlgmr.msra.gmra.mrb[14].mxu0 %vm741_vm1, %v978_v16 }
 0x373   :  { %2140 = vmatpush3.bf16.msra.mxu0 %v2139_v15  ;;  %1842 = vmatprep.mubr.msk.f32.mxu0 %vm2256_vm7, %v2252_v7 }
 0x374   :  { %2141 = vmatprep.subr.bf16.mxu0 %v2255_v55  ;;  %v2164_v55 = vpack.c.bf16 %v1219_v54, %v1218_v53  ;;  %v1322_v53 = vadd.f32 1e-10, %v1320_v50 }
 0x377   :  { %2143 = vmatpush3.bf16.msra.mxu0 %v2142_v21 }
 0x378   :  { %2145 = vmatprep.subr.bf16.mxu0 %v2144_v22 }
 0x37a   :  { %v2209_v23 = vpop.eup %2208 }
 0x37b   :  { %v2211_v24 = vpop.eup %2210  ;;  %v1083_v25 = vmul.f32 0.6931472, %v2209_v23 }
 0x37c   :  { %v1081_v26 = vmul.f32 0.6931472, %v2211_v24 }
 0x37d   :  { %v1085_v27 = vmul.f32 %v1083_v25, %v832_v4 }
 0x37e   :  { %v1084_v28 = vmul.f32 %v1081_v26, %v831_v8  ;;  %v1590_v8 = vmul.f32 -1.442695, %v1204_v5 }
 0x37f   :  { %v1087_v29 = vsel %vm741_vm1, %v1085_v27, 0.0 }
 0x380   :  { %v1086_v30 = vsel %vm741_vm1, %v1084_v28, 0.0  ;;  %2212 = vpow2.f32 %v1590_v8 }
 0x381   :  { %v1088_v32 = vadd.f32 %v1087_v29, %v1086_v30  ;;  %2214 = vpow2.f32 %v1591_v11 }
 0x383   :  { %v1089_v34 = vrot.slane %v1088_v32, 4 }
 0x385   :  { %v1090_v35 = vadd.f32 %v1089_v34, %v1088_v32 }
 0x387   :  { %v1091_v36 = vrot.slane %v1090_v35, 2 }
 0x389   :  { %v1092_v37 = vadd.f32 %v1091_v36, %v1090_v35 }
 0x38a   :  { %v2213_v12 = vpop.eup %2212 }
 0x38b   :  { %v1093_v40 = vrot.slane %v1092_v37, 1  ;;  %v1330_v13 = vadd.f32 1.0, %v2213_v12  ;;  %v2215_v14 = vpop.eup %2214 }
 0x38c   :  { %v1331_v15 = vadd.f32 1.0, %v2215_v14 }
 0x38d   :  { %v1094_v42 = vadd.f32 %v1093_v40, %v1092_v37  ;;  %2216 = vrcp.f32 %v1330_v13  ;;  %v1069_v40 = vrot.slane %v3023_v0, 4 }
 0x38e   :  { %2218 = vrcp.f32 %v1331_v15 }
 0x38f   :  { %1843 = vmatmul.mubr.msk.f32.vlgmr.msra.gmra.mrb[16].mxu0 %vm741_vm1, %v1094_v42  ;;  %v1070_v42 = vadd.f32 %v1069_v40, %v3023_v0 }
 0x390   :  { %2147 = vmatpush3.bf16.msra.mxu0 %v2144_v22  ;;  %1877 = vmatprep.mubr.f32.mxu0 %v1206_v43 }
 0x391   :  { %2149 = vmatprep.subr.bf16.mxu0 %v2148_v41 }
 0x394   :  { %2151 = vmatpush3.bf16.msra.mxu0 %v2148_v41  ;;  %v1071_v41 = vrot.slane %v1070_v42, 2 }
 0x395   :  { %2153 = vmatprep.subr.bf16.mxu0 %v2152_v46 }
 0x396   :  { %v1072_v43 = vadd.f32 %v1071_v41, %v1070_v42 }
 0x397   :  { %v2217_v19 = vpop.eup %2216 }
 0x398   :  { %2155 = vmatpush3.bf16.msra.mxu0 %v2152_v46  ;;  %v2219_v20 = vpop.eup %2218  ;;  %v1073_v44 = vrot.slane %v1072_v43, 1 }
 0x399   :  { %2157 = vmatprep.subr.bf16.mxu0 %v2156_v49 }
 0x39a   :  { %v1074_v45 = vadd.f32 %v1073_v44, %v1072_v43 }
 0x39c   :  { %2159 = vmatpush3.bf16.msra.mxu0 %v2156_v49  ;;  %v1075_v46 = vsel %vm741_vm1, %v1074_v45, 0.0  ;;  %v1194_v49 = vadd.f32 %v3008_v31, %v1587_v47 }
 0x39d   :  { %2161 = vmatprep.subr.bf16.mxu0 %v2160_v52 }
 0x39e   :  { %v1321_v51 = vand.u32 2147483647, %v1194_v49 }
 0x3a0   :  { %2163 = vmatpush3.bf16.msra.mxu0 %v2160_v52  ;;  %v1323_v54 = vadd.f32 1e-10, %v1321_v51 }
 0x3a1   :  { %2165 = vmatprep.subr.bf16.mxu0 %v2164_v55 }
 0x3a4   :  { %2167 = vmatpush3.bf16.msra.mxu0 %v2164_v55 }
 0x3a5   :  { %2169 = vmatprep.subr.bf16.mxu0 %v2168_v58 }
 0x3a8   :  { %2171 = vmatpush3.bf16.msra.mxu0 %v2168_v58 }
 0x3a9   :  { %2173 = vmatprep.subr.bf16.mxu0 %v2172_v61 }
 0x3ac   :  { %2175 = vmatpush3.bf16.msra.mxu0 %v2172_v61 }
 0x3af   :  { %1878 = vmatmul.mubr.f32.vlgmr.msra.gmra.mrb[18].mxu0 %v1207_v62 }
 0x445   :  { %v3143_v63 = vpop.f32.mrb[14].mxu0 }
 0x446   :  { %v3145_v1 = vpop.f32.mrb[15].mxu0  ;;  %v1061_v3 = vadd.f32 1e-10, %v3143_v63  ;;  %v2261_v63 = vmov 1.0  }
 0x462   :  { %v1168_v4 = vpop.f32.mrb[16].mxu0 }
 0x463   :  { %v1844_v6 = vpop.f32.mrb[17].mxu0 }
 0x482   :  { %v1879_v16 = vpop.f32.mrb[18].mxu0 }
 0x483   :  { %1303 = vrot.lane.b32.xlu0 %v1879_v16, %s2257_s2  ;;  %v1290_v17 = vpop.f32.mrb[19].mxu0 }
 0x484   :  { %1301 = vrot.lane.b32.xlu1 %v1290_v17, %s2257_s2 }
 0x487   :  { %1338 = vrot.lane.b32.xlu0 %v2217_v19, %s2258_s16 }
 0x488   :  { %1315 = vrot.lane.b32.xlu1 %v1589_v18, %s2257_s2  ;;  %v2262_v18 = vmov 1966171168  }
 0x489   :  { %v1548_v19 = vunpack.c.l.s4 %v2262_v18 }
 0x48c   :  { %1340 = vrot.lane.b32.xlu1 %v2219_v20, %s2258_s16  ;;  %v1549_v20 = vunpack.c.0.s8 %v1548_v19 }
 0x4f5   :  { %v1304_v21 = vpop.permute.xlu0 %1303 }
 0x4f6   :  { %v1302_v22 = vpop.permute.xlu1 %1301  ;;  %v1308_v23 = vadd.f32 %v3008_v31, %v1304_v21 }
 0x4f7   :  { %v1307_v24 = vadd.f32 %v1302_v22, %v3010_v33  ;;  %v1056_v33 = vadd.f32 1e-10, %v3145_v1 }
 0x4f9   :  { %v1339_v52 = vpop.permute.xlu0 %1338 }
 0x4fa   :  { %v1316_v25 = vpop.permute.xlu1 %1315  ;;  %v1344_v55 = vmul.f32 %v1339_v52, %v1322_v53 }
 0x4fb   :  { %v1318_v26 = vadd.f32 %v1316_v25, %v1307_v24  ;;  %v1319_v27 = vadd.f32 %v1316_v25, %v1308_v23  ;;  %v1552_v23 = vsub.s32 %v1549_v20, %v2983_v10 }
 0x4fd   :  { %v1592_v28 = vmul.f32 -1.442695, %v1318_v26  ;;  %v1593_v29 = vmul.f32 -1.442695, %v1319_v27 }
 0x4fe   :  { %v1341_v0 = vpop.permute.xlu1 %1340 }
 0x4ff   :  { %2220 = vpow2.f32 %v1592_v28  ;;  %v1345_v56 = vmul.f32 %v1341_v0, %v1323_v54 }
 0x500   :  { %2222 = vpow2.f32 %v1593_v29 }
 0x509   :  { %v2221_v30 = vpop.eup %2220 }
 0x50a   :  { %v2223_v32 = vpop.eup %2222  ;;  %v1352_v34 = vadd.f32 1.0, %v2221_v30 }
 0x50b   :  { %v1353_v35 = vadd.f32 1.0, %v2223_v32 }
 0x50c   :  { %2224 = vrcp.f32 %v1352_v34 }
 0x50d   :  { %2226 = vrcp.f32 %v1353_v35 }
 0x516   :  { %v2225_v36 = vpop.eup %2224 }
 0x517   :  { %v2227_v37 = vpop.eup %2226  ;;  %1360 = vrot.lane.b32.xlu0 %v2225_v36, %s2257_s2 }
 0x518   :  { %1362 = vrot.lane.b32.xlu1 %v2227_v37, %s2257_s2 }
 0x51b   :  { %1176 = vrot.lane.b32.xlu0 %v1172_v38, %s2253_s19 }
 0x51c   :  { %1178 = vrot.lane.b32.xlu1 %v1173_v39, %s2253_s19  ;;  %s1573_s19 = sshll.u32 %s2263_s12, 4  ;;  %s1574_s19 = int_to_ptr.vmem [resolvable:$true] %s1573_s19 }
 0x51d   :  { %s2228_s20 = scalar_lea.vmem %s1574_s19, 32  ;;  %p2233_p1 = scmp.lt.s32.totalorder %s1574_s19, %s1574_s19 }
 0x51e   :  { %p2229_p0 = scmp.ne.s32.totalorder %s1574_s19, %s2228_s20  ;;  %p2234_p2 = scmp.lt.s32.totalorder %s2228_s20, %s2228_s20 }
 0x520   :  { %1533 = vrot.lane.b32.xlu1 %v1168_v4, %s2259_s1  ;;  %p2235_p3 = por %p2234_p2, %p2233_p1 }
 0x522   :  { %p2236_p4 = pnand %p2235_p3, %p2229_p0 }
 0x53a   :  { %1076 = vadd.xlane.f32.xlu0 %v1075_v46 }
 0x589   :  { %v1361_v57 = vpop.permute.xlu0 %1360 }
 0x58a   :  { %v1366_v58 = vmul.f32 %v1361_v57, %v1344_v55  ;;  %v1363_v59 = vpop.permute.xlu1 %1362 }
 0x58b   :  { %v1367_v60 = vmul.f32 %v1363_v59, %v1345_v56 }
 0x58c   :  { %1888 = vmatprep.mubr.msk.f32.mxu1 %vm741_vm1, %v1366_v58 }
 0x58d   :  { %v1177_v61 = vpop.permute.xlu0 %1176  ;;  %1889 = vmatmul.mubr.msk.f32.vlgmr.msra.gmra.mrb[14].mxu1 %vm741_vm1, %v1367_v60 }
 0x58e   :  { %v1182_v31 = vsub.f32 %v1172_v38, %v1177_v61  ;;  %v1179_v62 = vpop.permute.xlu1 %1178  ;;  %1895 = vmatprep.mubr.msk.f32.mxu1 %vm2256_vm7, %v2252_v7 }
 0x58f   :  { %v1183_v4 = vsub.f32 %v1173_v39, %v1179_v62 }
 0x590   :  { %v1184_v5 = vmul.f32 %v1182_v31, %v1056_v33 }
 0x591   :  { %v1185_v6 = vmul.f32 %v1183_v4, %v1061_v3 }
 0x592   :  { %v1534_v8 = vpop.permute.xlu1 %1533 }
 0x5c7   :  { %v1077_v9 = vpop.xlane.xlu0 %1076 }
 0x5c8   :  { %v1537_v11 = vsel %vm1536_vm8, %v1077_v9, %v1534_v8 }
 0x5c9   :  { %v1539_v12 = vsel %vm1538_vm9, %v1537_v11, 0.0 }
 0x5ca   :  { %1541 = vrot.lane.b32.xlu1 %v1539_v12, %s2260_s0 }
 0x63c   :  { %v1542_v21 = vpop.permute.xlu1 %1541 }
 0x660   :  { %v1890_v13 = vpop.f32.mrb[14].mxu1 }
 0x661   :  { %v1597_v1 = vadd.f32 -1.0, %v1890_v13  ;;  %v1440_v14 = vpop.f32.mrb[15].mxu1 }
 0x662   :  { %v1596_v15 = vadd.f32 -1.0, %v1440_v14 }
 0x663   :  { %v1452_v16 = vmul.f32 %v1597_v1, %v1185_v6 }
 0x664   :  { %v1451_v17 = vmul.f32 %v1596_v15, %v1184_v5 }
 0x666   :  { %v2185_v7 = vpack.c.bf16 %v1452_v16, %v1451_v17 }
 0x668   :  { %2187 = vmatpush3.bf16.xpose.msk.msra.mxu1 %vm2186_vm10, %v2185_v7 }
 0x66f   :  { %1896 = vmatmul.mubr.msk.f32.vlgmr.msra.gmra.mrb[16].mxu1 %vm695_vm0, %v2261_v63 }
 0x742   :  { %v1528_v22 = vpop.f32.mrb[16].mxu1 }
 0x743   :  { %v1544_v24 = vsel %vm725_vm5, %v1528_v22, %v1542_v21  ;;  %v1897_v25 = vpop.f32.mrb[17].mxu1 }
 0x744   :  { %v1546_v26 = vcombine.low %v1544_v24, %v1542_v21 }
 0x746   :  { %v1553_v27 = vrot.slane %v1546_v26, %v1552_v23 }
 0x748   :  { %v1560_v28 = vrot.slane %v1553_v27, %v1552_v23 }
 0x74a   :  { %1566 = vst.msk [vmem:[#allocation2] sm:$0x3] %vm1564_vm11, %v1560_v28 }
 0x74b   :  { %2239 = shalt.err (!%p2236_p4)
}
 0x74c   :  { %s2240_s23 = scalar_lea.hbm %s3214_s15, 32 }
 0x74d   :  { %p2241_p5 = scmp.ne.s32.totalorder %s3214_s15, %s2240_s23  ;;  %p2244_p6 = scmp.lt.u32.totalorder %s2240_s23, %s3214_s15 }
 0x74f   :  { %p2246_p7 = pnand %p2244_p6, %p2241_p5 }
 0x751   :  { %2249 = shalt.err (!%p2246_p7)
}
 0x752   :  { %1576 = dma.vmem_to_hbm [thread:$0]  %s1574_s19, 32, %s3214_s15, [#allocation3]  }
 0x753   :  { %2250 = dma.done.wait [#allocation3], 32  }
 0x754   :  { %2251 = vsyncadd [#allocation3], 4294967264 }
 0x755   :  { %1580 = vsyncpa [#allocation3], 1 }

</bundles_post_ra>
